<compile_context>
chip_gen: v7x
topology: tpu7x:2x2x1
jax: 0.10.0
libtpu: 0.0.40
codegen_flags: <defaults>
</compile_context>

<pallas_src>
import jax
import jax.numpy as jnp
from jax import lax
from jax.experimental import pallas as pl
from jax.experimental.pallas import tpu as pltpu

# Deterministic "parameters" of the wrapped GPyTorch-style kernel
# (ScaleKernel(RBFKernel) with fixed lengthscale / outputscale, learn=False).
LENGTHSCALE = 0.75
OUTPUTSCALE = 1.5
LAMBDA_REG = 0.1

# Fold the -0.5 / ls^2 RBF factor into the inputs once:
#   ||alpha*x - alpha*y||^2 == 0.5 * ||x - y||^2 / ls^2   with alpha below.
_ALPHA = (0.5 ** 0.5) / LENGTHSCALE


def _recip(x):
    """EUP approximate reciprocal refined by one Newton step (~f32-exact)."""
    r = pl.reciprocal(x, approx=True)
    return r * (2.0 - x * r)


def _kernel_agg_kernel(ctx_ref, tgt_ref, enc_ref, out_ref):
    x = ctx_ref[...].astype(jnp.float32) * _ALPHA   # (BT, N, D), pre-scaled
    t = tgt_ref[...].astype(jnp.float32) * _ALPHA   # (BT, M, D), M == 1
    e = enc_ref[...].astype(jnp.float32)            # (BT, N, H)

    bt, n, _ = x.shape
    h = e.shape[2]

    # Batched Gram / cross matrices on the MXU (batch dim = BT).
    dn = (((2,), (2,)), ((0,), (0,)))
    xx = lax.dot_general(x, x, dn, preferred_element_type=jnp.float32)   # (BT,N,N)
    xt = lax.dot_general(x, t, dn, preferred_element_type=jnp.float32)   # (BT,N,1)

    x_sq = jnp.sum(x * x, axis=2, keepdims=True)     # (BT, N, 1)
    t_sq = jnp.sum(t * t, axis=2, keepdims=True)     # (BT, 1, 1)  (M == 1)

    rid = lax.broadcasted_iota(jnp.int32, (1, n, n), 1)
    cid = lax.broadcasted_iota(jnp.int32, (1, n, n), 2)
    eye = rid == cid

    # Row-wise squared norms laid out along lanes = diag(xx), via a masked
    # sublane reduce (avoids an explicit tiny transpose of x_sq).
    x_sq_row = jnp.sum(jnp.where(eye, xx, 0.0), axis=1, keepdims=True)   # (BT,1,N)

    K = OUTPUTSCALE * jnp.exp(-jnp.maximum(x_sq + x_sq_row - 2.0 * xx, 0.0))
    k_star = OUTPUTSCALE * jnp.exp(-jnp.maximum(x_sq + t_sq - 2.0 * xt, 0.0))

    A = K + jnp.where(eye, LAMBDA_REG, 0.0)          # (BT, N, N)
    Bm = k_star                                      # (BT, N, 1)

    # Gauss-Jordan solve, fully unrolled (n static & small), batched over BT.
    # A = K + lambda*I is SPD + diagonal regularization -> no pivoting needed.
    row_idx = lax.broadcasted_iota(jnp.int32, (1, n, 1), 1)
    for i in range(n):
        prow_A = A[:, i:i + 1, :]                    # (BT, 1, N)  static slice
        prow_B = Bm[:, i:i + 1, :]                   # (BT, 1, 1)
        inv_p = _recip(prow_A[:, :, i:i + 1])        # (BT, 1, 1)
        prow_A = prow_A * inv_p
        prow_B = prow_B * inv_p
        pcol = A[:, :, i:i + 1]                      # (BT, N, 1)
        is_piv = row_idx == i
        A = jnp.where(is_piv, prow_A, A - pcol * prow_A)
        Bm = jnp.where(is_piv, prow_B, Bm - pcol * prow_B)

    # softmax over the context axis (torch dim=1)
    W = Bm - jnp.max(Bm, axis=1, keepdims=True)
    W = jnp.exp(W)
    W = W * _recip(jnp.sum(W, axis=1, keepdims=True))

    # Final aggregation on the MXU: out[b, m, h] = sum_n W[b, n, m] * e[b, n, h]
    out = lax.dot_general(W, e, (((1,), (1,)), ((0,), (0,))),
                          preferred_element_type=jnp.float32)    # (BT, 1, H)
    out_ref[...] = out.reshape(bt, h).astype(out_ref.dtype)


def kernel_agg(context_xi, encoded, target_xi, *, batch_tile=None):
    """Pallas implementation of KernelAgg.forward(context_xi, encoded, target_xi)."""
    B, N, D = context_xi.shape
    _, M, _ = target_xi.shape
    H = encoded.shape[-1]
    assert M == 1, (
        "KernelAgg: the torch broadcast `weights * encoded` requires a single "
        f"target point (M == 1); got M={M}")

    # Process as many batches as possible per grid step (amortizes the per-step
    # overhead and makes DMAs / output stores dense).  At these shapes the whole
    # problem fits VMEM trivially; for very large B pass a smaller batch_tile.
    bt = B if batch_tile is None else min(batch_tile, B)
    while B % bt:               # keep blocks exact (no padding logic needed)
        bt -= 1

    return pl.pallas_call(
        _kernel_agg_kernel,
        out_shape=jax.ShapeDtypeStruct((B, H), jnp.float32),
        grid_spec=pltpu.PrefetchScalarGridSpec(
            num_scalar_prefetch=0,
            grid=(B // bt,),
            in_specs=[
                pl.BlockSpec((bt, N, D), lambda b: (b, 0, 0)),
                pl.BlockSpec((bt, M, D), lambda b: (b, 0, 0)),
                pl.BlockSpec((bt, N, H), lambda b: (b, 0, 0)),
            ],
            out_specs=pl.BlockSpec((bt, H), lambda b: (b, 0)),
        ),
        compiler_params=pltpu.CompilerParams(
            dimension_semantics=("parallel",)),   # lets v7x use both TCs
    )(context_xi, target_xi, encoded)


def _reference(context_xi, encoded, target_xi):
    """Plain-JAX reference mirroring the torch forward exactly."""
    def rbf(x, y):
        sq = jnp.sum((x[:, :, None, :] - y[:, None, :, :]) ** 2, axis=-1)
        return OUTPUTSCALE * jnp.exp(-0.5 * sq / (LENGTHSCALE ** 2))

    K = rbf(context_xi, context_xi)                               # (B, N, N)
    reg = LAMBDA_REG * jnp.eye(K.shape[1], dtype=K.dtype)[None]
    k_star = rbf(context_xi, target_xi)                           # (B, N, M)
    weights = jnp.linalg.solve(K + reg, k_star)                   # == inverse @ k_star
    weights = jax.nn.softmax(weights, axis=1)
    return jnp.sum(weights * encoded, axis=1)                     # (B, H)


if __name__ == "__main__":
    B, N, M, D, H = 2, 8, 1, 4, 32
    key = jax.random.PRNGKey(0)
    k1, k2, k3 = jax.random.split(key, 3)
    context_xi = jax.random.normal(k1, (B, N, D), jnp.float32)
    target_xi = jax.random.normal(k2, (B, M, D), jnp.float32)
    encoded = jax.random.normal(k3, (B, N, H), jnp.float32)

    out = kernel_agg(context_xi, encoded, target_xi)
    out = jax.block_until_ready(out)

    ref = _reference(context_xi, encoded, target_xi)
    assert out.shape == (B, H), out.shape
    assert jnp.allclose(out, ref, rtol=1e-3, atol=1e-3), \
        f"max abs err {jnp.max(jnp.abs(out - ref))}"

    print("KERNEL_OK")
</pallas_src>

<mosaic_0001>
module attributes {stable_mosaic.version = 11 : i64} {
  func.func @_kernel_agg_kernel(%arg0: i32, %arg1: memref<2x8x4xf32, #tpu.memory_space<vmem>>, %arg2: memref<2x1x4xf32, #tpu.memory_space<vmem>>, %arg3: memref<2x8x32xf32, #tpu.memory_space<vmem>>, %arg4: memref<2x32xf32, #tpu.memory_space<vmem>>) attributes {dimension_semantics = [#tpu.dimension_semantics<parallel>], iteration_bounds = array<i64: 1>, scalar_prefetch = 0 : i64, scratch_operands = 0 : i64, tpu.core_type = #tpu.core_type<tc>, window_params = [{transform_indices = @transform_0, window_bounds = array<i64: 2, 8, 4>}, {transform_indices = @transform_1, window_bounds = array<i64: 2, 1, 4>}, {transform_indices = @transform_2, window_bounds = array<i64: 2, 8, 32>}, {transform_indices = @transform_3, window_bounds = array<i64: 2, 32>}]} {
    %c0 = arith.constant 0 : index
    %c0_0 = arith.constant 0 : index
    %c0_1 = arith.constant 0 : index
    %0 = vector.load %arg1[%c0, %c0_0, %c0_1] : memref<2x8x4xf32, #tpu.memory_space<vmem>>, vector<2x8x4xf32>
    %cst = arith.constant 0.942809045 : f32
    %1 = vector.broadcast %cst : f32 to vector<2x8x4xf32>
    %2 = arith.mulf %0, %1 : vector<2x8x4xf32>
    %c0_2 = arith.constant 0 : index
    %c0_3 = arith.constant 0 : index
    %c0_4 = arith.constant 0 : index
    %3 = vector.load %arg2[%c0_2, %c0_3, %c0_4] : memref<2x1x4xf32, #tpu.memory_space<vmem>>, vector<2x1x4xf32>
    %cst_5 = arith.constant 0.942809045 : f32
    %4 = vector.broadcast %cst_5 : f32 to vector<2x1x4xf32>
    %5 = arith.mulf %3, %4 : vector<2x1x4xf32>
    %c0_6 = arith.constant 0 : index
    %c0_7 = arith.constant 0 : index
    %c0_8 = arith.constant 0 : index
    %6 = vector.load %arg3[%c0_6, %c0_7, %c0_8] : memref<2x8x32xf32, #tpu.memory_space<vmem>>, vector<2x8x32xf32>
    %cst_9 = arith.constant dense<0.000000e+00> : vector<2x8x8xf32>
    %7 = tpu.matmul %2, %2, %cst_9 {dimension_numbers = #tpu.dot_dimension_numbers<[2], [2], [1], [1], [0, 0, 0, 1, 1, 1], [0], [0]>} : vector<2x8x4xf32>, vector<2x8x4xf32>, vector<2x8x8xf32> -> vector<2x8x8xf32>
    %cst_10 = arith.constant dense<0.000000e+00> : vector<2x8x1xf32>
    %8 = tpu.matmul %2, %5, %cst_10 {dimension_numbers = #tpu.dot_dimension_numbers<[2], [2], [1], [1], [0, 0, 0, 1, 1, 1], [0], [0]>} : vector<2x8x4xf32>, vector<2x1x4xf32>, vector<2x8x1xf32> -> vector<2x8x1xf32>
    %9 = arith.mulf %2, %2 : vector<2x8x4xf32>
    %cst_11 = arith.constant dense<0.000000e+00> : vector<2x8xf32>
    %10 = vector.multi_reduction <add>, %9, %cst_11 [2] : vector<2x8x4xf32> to vector<2x8xf32>
    %11 = vector.shape_cast %10 : vector<2x8xf32> to vector<2x8x1xf32>
    %12 = arith.mulf %5, %5 : vector<2x1x4xf32>
    %cst_12 = arith.constant dense<0.000000e+00> : vector<2x1xf32>
    %13 = vector.multi_reduction <add>, %12, %cst_12 [2] : vector<2x1x4xf32> to vector<2x1xf32>
    %14 = vector.shape_cast %13 : vector<2x1xf32> to vector<2x1x1xf32>
    %15 = tpu.iota {dimensions = array<i32: 1>} : vector<1x8x8xi32>
    %16 = tpu.iota {dimensions = array<i32: 2>} : vector<1x8x8xi32>
    %17 = arith.cmpi eq, %15, %16 : vector<1x8x8xi32>
    %cst_13 = arith.constant 0.000000e+00 : f32
    %18 = vector.shape_cast %17 : vector<1x8x8xi1> to vector<1x8x8xi1>
    %19 = vector.broadcast %18 : vector<1x8x8xi1> to vector<2x8x8xi1>
    %20 = vector.broadcast %cst_13 : f32 to vector<2x8x8xf32>
    %21 = arith.select %19, %7, %20 : vector<2x8x8xi1>, vector<2x8x8xf32>
    %cst_14 = arith.constant dense<0.000000e+00> : vector<2x8xf32>
    %22 = vector.multi_reduction <add>, %21, %cst_14 [1] : vector<2x8x8xf32> to vector<2x8xf32>
    %23 = vector.shape_cast %22 : vector<2x8xf32> to vector<2x1x8xf32>
    %24 = vector.broadcast %11 : vector<2x8x1xf32> to vector<2x8x8xf32>
    %25 = vector.broadcast %23 : vector<2x1x8xf32> to vector<2x8x8xf32>
    %26 = arith.addf %24, %25 : vector<2x8x8xf32>
    %cst_15 = arith.constant 2.000000e+00 : f32
    %27 = vector.broadcast %cst_15 : f32 to vector<2x8x8xf32>
    %28 = arith.mulf %27, %7 : vector<2x8x8xf32>
    %29 = arith.subf %26, %28 : vector<2x8x8xf32>
    %cst_16 = arith.constant 0.000000e+00 : f32
    %30 = vector.broadcast %cst_16 : f32 to vector<2x8x8xf32>
    %31 = arith.maximumf %29, %30 : vector<2x8x8xf32>
    %cst_17 = arith.constant 0.000000e+00 : f32
    %32 = vector.broadcast %cst_17 : f32 to vector<2x8x8xf32>
    %33 = arith.subf %32, %31 : vector<2x8x8xf32>
    %34 = math.exp %33 : vector<2x8x8xf32>
    %cst_18 = arith.constant 1.500000e+00 : f32
    %35 = vector.broadcast %cst_18 : f32 to vector<2x8x8xf32>
    %36 = arith.mulf %35, %34 : vector<2x8x8xf32>
    %37 = vector.broadcast %14 : vector<2x1x1xf32> to vector<2x8x1xf32>
    %38 = arith.addf %11, %37 : vector<2x8x1xf32>
    %cst_19 = arith.constant 2.000000e+00 : f32
    %39 = vector.broadcast %cst_19 : f32 to vector<2x8x1xf32>
    %40 = arith.mulf %39, %8 : vector<2x8x1xf32>
    %41 = arith.subf %38, %40 : vector<2x8x1xf32>
    %cst_20 = arith.constant 0.000000e+00 : f32
    %42 = vector.broadcast %cst_20 : f32 to vector<2x8x1xf32>
    %43 = arith.maximumf %41, %42 : vector<2x8x1xf32>
    %cst_21 = arith.constant 0.000000e+00 : f32
    %44 = vector.broadcast %cst_21 : f32 to vector<2x8x1xf32>
    %45 = arith.subf %44, %43 : vector<2x8x1xf32>
    %46 = math.exp %45 : vector<2x8x1xf32>
    %cst_22 = arith.constant 1.500000e+00 : f32
    %47 = vector.broadcast %cst_22 : f32 to vector<2x8x1xf32>
    %48 = arith.mulf %47, %46 : vector<2x8x1xf32>
    %cst_23 = arith.constant 1.000000e-01 : f32
    %cst_24 = arith.constant 0.000000e+00 : f32
    %49 = vector.broadcast %cst_23 : f32 to vector<1x8x8xf32>
    %50 = vector.broadcast %cst_24 : f32 to vector<1x8x8xf32>
    %51 = arith.select %17, %49, %50 : vector<1x8x8xi1>, vector<1x8x8xf32>
    %52 = vector.broadcast %51 : vector<1x8x8xf32> to vector<2x8x8xf32>
    %53 = arith.addf %36, %52 : vector<2x8x8xf32>
    %54 = tpu.iota {dimensions = array<i32: 1>} : vector<1x8x1xi32>
    %55 = vector.extract_strided_slice %53 {offsets = [0, 0, 0], sizes = [2, 1, 8], strides = [1, 1, 1]} : vector<2x8x8xf32> to vector<2x1x8xf32>
    %56 = vector.extract_strided_slice %48 {offsets = [0, 0, 0], sizes = [2, 1, 1], strides = [1, 1, 1]} : vector<2x8x1xf32> to vector<2x1x1xf32>
    %57 = vector.extract_strided_slice %55 {offsets = [0, 0, 0], sizes = [2, 1, 1], strides = [1, 1, 1]} : vector<2x1x8xf32> to vector<2x1x1xf32>
    %58 = tpu.reciprocal %57 {approx = true} : vector<2x1x1xf32> -> vector<2x1x1xf32>
    %59 = arith.mulf %57, %58 : vector<2x1x1xf32>
    %cst_25 = arith.constant 2.000000e+00 : f32
    %60 = vector.broadcast %cst_25 : f32 to vector<2x1x1xf32>
    %61 = arith.subf %60, %59 : vector<2x1x1xf32>
    %62 = arith.mulf %58, %61 : vector<2x1x1xf32>
    %63 = vector.broadcast %62 : vector<2x1x1xf32> to vector<2x1x8xf32>
    %64 = arith.mulf %55, %63 : vector<2x1x8xf32>
    %65 = arith.mulf %56, %62 : vector<2x1x1xf32>
    %66 = vector.extract_strided_slice %53 {offsets = [0, 0, 0], sizes = [2, 8, 1], strides = [1, 1, 1]} : vector<2x8x8xf32> to vector<2x8x1xf32>
    %c0_i32 = arith.constant 0 : i32
    %67 = vector.broadcast %c0_i32 : i32 to vector<1x8x1xi32>
    %68 = arith.cmpi eq, %54, %67 : vector<1x8x1xi32>
    %69 = vector.broadcast %66 : vector<2x8x1xf32> to vector<2x8x8xf32>
    %70 = vector.broadcast %64 : vector<2x1x8xf32> to vector<2x8x8xf32>
    %71 = arith.mulf %69, %70 : vector<2x8x8xf32>
    %72 = arith.subf %53, %71 : vector<2x8x8xf32>
    %73 = vector.shape_cast %68 : vector<1x8x1xi1> to vector<1x8x1xi1>
    %74 = vector.broadcast %73 : vector<1x8x1xi1> to vector<2x8x8xi1>
    %75 = vector.shape_cast %64 : vector<2x1x8xf32> to vector<2x1x8xf32>
    %76 = vector.broadcast %75 : vector<2x1x8xf32> to vector<2x8x8xf32>
    %77 = arith.select %74, %76, %72 : vector<2x8x8xi1>, vector<2x8x8xf32>
    %78 = vector.broadcast %65 : vector<2x1x1xf32> to vector<2x8x1xf32>
    %79 = arith.mulf %66, %78 : vector<2x8x1xf32>
    %80 = arith.subf %48, %79 : vector<2x8x1xf32>
    %81 = vector.shape_cast %68 : vector<1x8x1xi1> to vector<1x8x1xi1>
    %82 = vector.broadcast %81 : vector<1x8x1xi1> to vector<2x8x1xi1>
    %83 = vector.shape_cast %65 : vector<2x1x1xf32> to vector<2x1x1xf32>
    %84 = vector.broadcast %83 : vector<2x1x1xf32> to vector<2x8x1xf32>
    %85 = arith.select %82, %84, %80 : vector<2x8x1xi1>, vector<2x8x1xf32>
    %86 = vector.extract_strided_slice %77 {offsets = [0, 1, 0], sizes = [2, 1, 8], strides = [1, 1, 1]} : vector<2x8x8xf32> to vector<2x1x8xf32>
    %87 = vector.extract_strided_slice %85 {offsets = [0, 1, 0], sizes = [2, 1, 1], strides = [1, 1, 1]} : vector<2x8x1xf32> to vector<2x1x1xf32>
    %88 = vector.extract_strided_slice %86 {offsets = [0, 0, 1], sizes = [2, 1, 1], strides = [1, 1, 1]} : vector<2x1x8xf32> to vector<2x1x1xf32>
    %89 = tpu.reciprocal %88 {approx = true} : vector<2x1x1xf32> -> vector<2x1x1xf32>
    %90 = arith.mulf %88, %89 : vector<2x1x1xf32>
    %cst_26 = arith.constant 2.000000e+00 : f32
    %91 = vector.broadcast %cst_26 : f32 to vector<2x1x1xf32>
    %92 = arith.subf %91, %90 : vector<2x1x1xf32>
    %93 = arith.mulf %89, %92 : vector<2x1x1xf32>
    %94 = vector.broadcast %93 : vector<2x1x1xf32> to vector<2x1x8xf32>
    %95 = arith.mulf %86, %94 : vector<2x1x8xf32>
    %96 = arith.mulf %87, %93 : vector<2x1x1xf32>
    %97 = vector.extract_strided_slice %77 {offsets = [0, 0, 1], sizes = [2, 8, 1], strides = [1, 1, 1]} : vector<2x8x8xf32> to vector<2x8x1xf32>
    %c1_i32 = arith.constant 1 : i32
    %98 = vector.broadcast %c1_i32 : i32 to vector<1x8x1xi32>
    %99 = arith.cmpi eq, %54, %98 : vector<1x8x1xi32>
    %100 = vector.broadcast %97 : vector<2x8x1xf32> to vector<2x8x8xf32>
    %101 = vector.broadcast %95 : vector<2x1x8xf32> to vector<2x8x8xf32>
    %102 = arith.mulf %100, %101 : vector<2x8x8xf32>
    %103 = arith.subf %77, %102 : vector<2x8x8xf32>
    %104 = vector.shape_cast %99 : vector<1x8x1xi1> to vector<1x8x1xi1>
    %105 = vector.broadcast %104 : vector<1x8x1xi1> to vector<2x8x8xi1>
    %106 = vector.shape_cast %95 : vector<2x1x8xf32> to vector<2x1x8xf32>
    %107 = vector.broadcast %106 : vector<2x1x8xf32> to vector<2x8x8xf32>
    %108 = arith.select %105, %107, %103 : vector<2x8x8xi1>, vector<2x8x8xf32>
    %109 = vector.broadcast %96 : vector<2x1x1xf32> to vector<2x8x1xf32>
    %110 = arith.mulf %97, %109 : vector<2x8x1xf32>
    %111 = arith.subf %85, %110 : vector<2x8x1xf32>
    %112 = vector.shape_cast %99 : vector<1x8x1xi1> to vector<1x8x1xi1>
    %113 = vector.broadcast %112 : vector<1x8x1xi1> to vector<2x8x1xi1>
    %114 = vector.shape_cast %96 : vector<2x1x1xf32> to vector<2x1x1xf32>
    %115 = vector.broadcast %114 : vector<2x1x1xf32> to vector<2x8x1xf32>
    %116 = arith.select %113, %115, %111 : vector<2x8x1xi1>, vector<2x8x1xf32>
    %117 = vector.extract_strided_slice %108 {offsets = [0, 2, 0], sizes = [2, 1, 8], strides = [1, 1, 1]} : vector<2x8x8xf32> to vector<2x1x8xf32>
    %118 = vector.extract_strided_slice %116 {offsets = [0, 2, 0], sizes = [2, 1, 1], strides = [1, 1, 1]} : vector<2x8x1xf32> to vector<2x1x1xf32>
    %119 = vector.extract_strided_slice %117 {offsets = [0, 0, 2], sizes = [2, 1, 1], strides = [1, 1, 1]} : vector<2x1x8xf32> to vector<2x1x1xf32>
    %120 = tpu.reciprocal %119 {approx = true} : vector<2x1x1xf32> -> vector<2x1x1xf32>
    %121 = arith.mulf %119, %120 : vector<2x1x1xf32>
    %cst_27 = arith.constant 2.000000e+00 : f32
    %122 = vector.broadcast %cst_27 : f32 to vector<2x1x1xf32>
    %123 = arith.subf %122, %121 : vector<2x1x1xf32>
    %124 = arith.mulf %120, %123 : vector<2x1x1xf32>
    %125 = vector.broadcast %124 : vector<2x1x1xf32> to vector<2x1x8xf32>
    %126 = arith.mulf %117, %125 : vector<2x1x8xf32>
    %127 = arith.mulf %118, %124 : vector<2x1x1xf32>
    %128 = vector.extract_strided_slice %108 {offsets = [0, 0, 2], sizes = [2, 8, 1], strides = [1, 1, 1]} : vector<2x8x8xf32> to vector<2x8x1xf32>
    %c2_i32 = arith.constant 2 : i32
    %129 = vector.broadcast %c2_i32 : i32 to vector<1x8x1xi32>
    %130 = arith.cmpi eq, %54, %129 : vector<1x8x1xi32>
    %131 = vector.broadcast %128 : vector<2x8x1xf32> to vector<2x8x8xf32>
    %132 = vector.broadcast %126 : vector<2x1x8xf32> to vector<2x8x8xf32>
    %133 = arith.mulf %131, %132 : vector<2x8x8xf32>
    %134 = arith.subf %108, %133 : vector<2x8x8xf32>
    %135 = vector.shape_cast %130 : vector<1x8x1xi1> to vector<1x8x1xi1>
    %136 = vector.broadcast %135 : vector<1x8x1xi1> to vector<2x8x8xi1>
    %137 = vector.shape_cast %126 : vector<2x1x8xf32> to vector<2x1x8xf32>
    %138 = vector.broadcast %137 : vector<2x1x8xf32> to vector<2x8x8xf32>
    %139 = arith.select %136, %138, %134 : vector<2x8x8xi1>, vector<2x8x8xf32>
    %140 = vector.broadcast %127 : vector<2x1x1xf32> to vector<2x8x1xf32>
    %141 = arith.mulf %128, %140 : vector<2x8x1xf32>
    %142 = arith.subf %116, %141 : vector<2x8x1xf32>
    %143 = vector.shape_cast %130 : vector<1x8x1xi1> to vector<1x8x1xi1>
    %144 = vector.broadcast %143 : vector<1x8x1xi1> to vector<2x8x1xi1>
    %145 = vector.shape_cast %127 : vector<2x1x1xf32> to vector<2x1x1xf32>
    %146 = vector.broadcast %145 : vector<2x1x1xf32> to vector<2x8x1xf32>
    %147 = arith.select %144, %146, %142 : vector<2x8x1xi1>, vector<2x8x1xf32>
    %148 = vector.extract_strided_slice %139 {offsets = [0, 3, 0], sizes = [2, 1, 8], strides = [1, 1, 1]} : vector<2x8x8xf32> to vector<2x1x8xf32>
    %149 = vector.extract_strided_slice %147 {offsets = [0, 3, 0], sizes = [2, 1, 1], strides = [1, 1, 1]} : vector<2x8x1xf32> to vector<2x1x1xf32>
    %150 = vector.extract_strided_slice %148 {offsets = [0, 0, 3], sizes = [2, 1, 1], strides = [1, 1, 1]} : vector<2x1x8xf32> to vector<2x1x1xf32>
    %151 = tpu.reciprocal %150 {approx = true} : vector<2x1x1xf32> -> vector<2x1x1xf32>
    %152 = arith.mulf %150, %151 : vector<2x1x1xf32>
    %cst_28 = arith.constant 2.000000e+00 : f32
    %153 = vector.broadcast %cst_28 : f32 to vector<2x1x1xf32>
    %154 = arith.subf %153, %152 : vector<2x1x1xf32>
    %155 = arith.mulf %151, %154 : vector<2x1x1xf32>
    %156 = vector.broadcast %155 : vector<2x1x1xf32> to vector<2x1x8xf32>
    %157 = arith.mulf %148, %156 : vector<2x1x8xf32>
    %158 = arith.mulf %149, %155 : vector<2x1x1xf32>
    %159 = vector.extract_strided_slice %139 {offsets = [0, 0, 3], sizes = [2, 8, 1], strides = [1, 1, 1]} : vector<2x8x8xf32> to vector<2x8x1xf32>
    %c3_i32 = arith.constant 3 : i32
    %160 = vector.broadcast %c3_i32 : i32 to vector<1x8x1xi32>
    %161 = arith.cmpi eq, %54, %160 : vector<1x8x1xi32>
    %162 = vector.broadcast %159 : vector<2x8x1xf32> to vector<2x8x8xf32>
    %163 = vector.broadcast %157 : vector<2x1x8xf32> to vector<2x8x8xf32>
    %164 = arith.mulf %162, %163 : vector<2x8x8xf32>
    %165 = arith.subf %139, %164 : vector<2x8x8xf32>
    %166 = vector.shape_cast %161 : vector<1x8x1xi1> to vector<1x8x1xi1>
    %167 = vector.broadcast %166 : vector<1x8x1xi1> to vector<2x8x8xi1>
    %168 = vector.shape_cast %157 : vector<2x1x8xf32> to vector<2x1x8xf32>
    %169 = vector.broadcast %168 : vector<2x1x8xf32> to vector<2x8x8xf32>
    %170 = arith.select %167, %169, %165 : vector<2x8x8xi1>, vector<2x8x8xf32>
    %171 = vector.broadcast %158 : vector<2x1x1xf32> to vector<2x8x1xf32>
    %172 = arith.mulf %159, %171 : vector<2x8x1xf32>
    %173 = arith.subf %147, %172 : vector<2x8x1xf32>
    %174 = vector.shape_cast %161 : vector<1x8x1xi1> to vector<1x8x1xi1>
    %175 = vector.broadcast %174 : vector<1x8x1xi1> to vector<2x8x1xi1>
    %176 = vector.shape_cast %158 : vector<2x1x1xf32> to vector<2x1x1xf32>
    %177 = vector.broadcast %176 : vector<2x1x1xf32> to vector<2x8x1xf32>
    %178 = arith.select %175, %177, %173 : vector<2x8x1xi1>, vector<2x8x1xf32>
    %179 = vector.extract_strided_slice %170 {offsets = [0, 4, 0], sizes = [2, 1, 8], strides = [1, 1, 1]} : vector<2x8x8xf32> to vector<2x1x8xf32>
    %180 = vector.extract_strided_slice %178 {offsets = [0, 4, 0], sizes = [2, 1, 1], strides = [1, 1, 1]} : vector<2x8x1xf32> to vector<2x1x1xf32>
    %181 = vector.extract_strided_slice %179 {offsets = [0, 0, 4], sizes = [2, 1, 1], strides = [1, 1, 1]} : vector<2x1x8xf32> to vector<2x1x1xf32>
    %182 = tpu.reciprocal %181 {approx = true} : vector<2x1x1xf32> -> vector<2x1x1xf32>
    %183 = arith.mulf %181, %182 : vector<2x1x1xf32>
    %cst_29 = arith.constant 2.000000e+00 : f32
    %184 = vector.broadcast %cst_29 : f32 to vector<2x1x1xf32>
    %185 = arith.subf %184, %183 : vector<2x1x1xf32>
    %186 = arith.mulf %182, %185 : vector<2x1x1xf32>
    %187 = vector.broadcast %186 : vector<2x1x1xf32> to vector<2x1x8xf32>
    %188 = arith.mulf %179, %187 : vector<2x1x8xf32>
    %189 = arith.mulf %180, %186 : vector<2x1x1xf32>
    %190 = vector.extract_strided_slice %170 {offsets = [0, 0, 4], sizes = [2, 8, 1], strides = [1, 1, 1]} : vector<2x8x8xf32> to vector<2x8x1xf32>
    %c4_i32 = arith.constant 4 : i32
    %191 = vector.broadcast %c4_i32 : i32 to vector<1x8x1xi32>
    %192 = arith.cmpi eq, %54, %191 : vector<1x8x1xi32>
    %193 = vector.broadcast %190 : vector<2x8x1xf32> to vector<2x8x8xf32>
    %194 = vector.broadcast %188 : vector<2x1x8xf32> to vector<2x8x8xf32>
    %195 = arith.mulf %193, %194 : vector<2x8x8xf32>
    %196 = arith.subf %170, %195 : vector<2x8x8xf32>
    %197 = vector.shape_cast %192 : vector<1x8x1xi1> to vector<1x8x1xi1>
    %198 = vector.broadcast %197 : vector<1x8x1xi1> to vector<2x8x8xi1>
    %199 = vector.shape_cast %188 : vector<2x1x8xf32> to vector<2x1x8xf32>
    %200 = vector.broadcast %199 : vector<2x1x8xf32> to vector<2x8x8xf32>
    %201 = arith.select %198, %200, %196 : vector<2x8x8xi1>, vector<2x8x8xf32>
    %202 = vector.broadcast %189 : vector<2x1x1xf32> to vector<2x8x1xf32>
    %203 = arith.mulf %190, %202 : vector<2x8x1xf32>
    %204 = arith.subf %178, %203 : vector<2x8x1xf32>
    %205 = vector.shape_cast %192 : vector<1x8x1xi1> to vector<1x8x1xi1>
    %206 = vector.broadcast %205 : vector<1x8x1xi1> to vector<2x8x1xi1>
    %207 = vector.shape_cast %189 : vector<2x1x1xf32> to vector<2x1x1xf32>
    %208 = vector.broadcast %207 : vector<2x1x1xf32> to vector<2x8x1xf32>
    %209 = arith.select %206, %208, %204 : vector<2x8x1xi1>, vector<2x8x1xf32>
    %210 = vector.extract_strided_slice %201 {offsets = [0, 5, 0], sizes = [2, 1, 8], strides = [1, 1, 1]} : vector<2x8x8xf32> to vector<2x1x8xf32>
    %211 = vector.extract_strided_slice %209 {offsets = [0, 5, 0], sizes = [2, 1, 1], strides = [1, 1, 1]} : vector<2x8x1xf32> to vector<2x1x1xf32>
    %212 = vector.extract_strided_slice %210 {offsets = [0, 0, 5], sizes = [2, 1, 1], strides = [1, 1, 1]} : vector<2x1x8xf32> to vector<2x1x1xf32>
    %213 = tpu.reciprocal %212 {approx = true} : vector<2x1x1xf32> -> vector<2x1x1xf32>
    %214 = arith.mulf %212, %213 : vector<2x1x1xf32>
    %cst_30 = arith.constant 2.000000e+00 : f32
    %215 = vector.broadcast %cst_30 : f32 to vector<2x1x1xf32>
    %216 = arith.subf %215, %214 : vector<2x1x1xf32>
    %217 = arith.mulf %213, %216 : vector<2x1x1xf32>
    %218 = vector.broadcast %217 : vector<2x1x1xf32> to vector<2x1x8xf32>
    %219 = arith.mulf %210, %218 : vector<2x1x8xf32>
    %220 = arith.mulf %211, %217 : vector<2x1x1xf32>
    %221 = vector.extract_strided_slice %201 {offsets = [0, 0, 5], sizes = [2, 8, 1], strides = [1, 1, 1]} : vector<2x8x8xf32> to vector<2x8x1xf32>
    %c5_i32 = arith.constant 5 : i32
    %222 = vector.broadcast %c5_i32 : i32 to vector<1x8x1xi32>
    %223 = arith.cmpi eq, %54, %222 : vector<1x8x1xi32>
    %224 = vector.broadcast %221 : vector<2x8x1xf32> to vector<2x8x8xf32>
    %225 = vector.broadcast %219 : vector<2x1x8xf32> to vector<2x8x8xf32>
    %226 = arith.mulf %224, %225 : vector<2x8x8xf32>
    %227 = arith.subf %201, %226 : vector<2x8x8xf32>
    %228 = vector.shape_cast %223 : vector<1x8x1xi1> to vector<1x8x1xi1>
    %229 = vector.broadcast %228 : vector<1x8x1xi1> to vector<2x8x8xi1>
    %230 = vector.shape_cast %219 : vector<2x1x8xf32> to vector<2x1x8xf32>
    %231 = vector.broadcast %230 : vector<2x1x8xf32> to vector<2x8x8xf32>
    %232 = arith.select %229, %231, %227 : vector<2x8x8xi1>, vector<2x8x8xf32>
    %233 = vector.broadcast %220 : vector<2x1x1xf32> to vector<2x8x1xf32>
    %234 = arith.mulf %221, %233 : vector<2x8x1xf32>
    %235 = arith.subf %209, %234 : vector<2x8x1xf32>
    %236 = vector.shape_cast %223 : vector<1x8x1xi1> to vector<1x8x1xi1>
    %237 = vector.broadcast %236 : vector<1x8x1xi1> to vector<2x8x1xi1>
    %238 = vector.shape_cast %220 : vector<2x1x1xf32> to vector<2x1x1xf32>
    %239 = vector.broadcast %238 : vector<2x1x1xf32> to vector<2x8x1xf32>
    %240 = arith.select %237, %239, %235 : vector<2x8x1xi1>, vector<2x8x1xf32>
    %241 = vector.extract_strided_slice %232 {offsets = [0, 6, 0], sizes = [2, 1, 8], strides = [1, 1, 1]} : vector<2x8x8xf32> to vector<2x1x8xf32>
    %242 = vector.extract_strided_slice %240 {offsets = [0, 6, 0], sizes = [2, 1, 1], strides = [1, 1, 1]} : vector<2x8x1xf32> to vector<2x1x1xf32>
    %243 = vector.extract_strided_slice %241 {offsets = [0, 0, 6], sizes = [2, 1, 1], strides = [1, 1, 1]} : vector<2x1x8xf32> to vector<2x1x1xf32>
    %244 = tpu.reciprocal %243 {approx = true} : vector<2x1x1xf32> -> vector<2x1x1xf32>
    %245 = arith.mulf %243, %244 : vector<2x1x1xf32>
    %cst_31 = arith.constant 2.000000e+00 : f32
    %246 = vector.broadcast %cst_31 : f32 to vector<2x1x1xf32>
    %247 = arith.subf %246, %245 : vector<2x1x1xf32>
    %248 = arith.mulf %244, %247 : vector<2x1x1xf32>
    %249 = vector.broadcast %248 : vector<2x1x1xf32> to vector<2x1x8xf32>
    %250 = arith.mulf %241, %249 : vector<2x1x8xf32>
    %251 = arith.mulf %242, %248 : vector<2x1x1xf32>
    %252 = vector.extract_strided_slice %232 {offsets = [0, 0, 6], sizes = [2, 8, 1], strides = [1, 1, 1]} : vector<2x8x8xf32> to vector<2x8x1xf32>
    %c6_i32 = arith.constant 6 : i32
    %253 = vector.broadcast %c6_i32 : i32 to vector<1x8x1xi32>
    %254 = arith.cmpi eq, %54, %253 : vector<1x8x1xi32>
    %255 = vector.broadcast %252 : vector<2x8x1xf32> to vector<2x8x8xf32>
    %256 = vector.broadcast %250 : vector<2x1x8xf32> to vector<2x8x8xf32>
    %257 = arith.mulf %255, %256 : vector<2x8x8xf32>
    %258 = arith.subf %232, %257 : vector<2x8x8xf32>
    %259 = vector.shape_cast %254 : vector<1x8x1xi1> to vector<1x8x1xi1>
    %260 = vector.broadcast %259 : vector<1x8x1xi1> to vector<2x8x8xi1>
    %261 = vector.shape_cast %250 : vector<2x1x8xf32> to vector<2x1x8xf32>
    %262 = vector.broadcast %261 : vector<2x1x8xf32> to vector<2x8x8xf32>
    %263 = arith.select %260, %262, %258 : vector<2x8x8xi1>, vector<2x8x8xf32>
    %264 = vector.broadcast %251 : vector<2x1x1xf32> to vector<2x8x1xf32>
    %265 = arith.mulf %252, %264 : vector<2x8x1xf32>
    %266 = arith.subf %240, %265 : vector<2x8x1xf32>
    %267 = vector.shape_cast %254 : vector<1x8x1xi1> to vector<1x8x1xi1>
    %268 = vector.broadcast %267 : vector<1x8x1xi1> to vector<2x8x1xi1>
    %269 = vector.shape_cast %251 : vector<2x1x1xf32> to vector<2x1x1xf32>
    %270 = vector.broadcast %269 : vector<2x1x1xf32> to vector<2x8x1xf32>
    %271 = arith.select %268, %270, %266 : vector<2x8x1xi1>, vector<2x8x1xf32>
    %272 = vector.extract_strided_slice %263 {offsets = [0, 7, 0], sizes = [2, 1, 8], strides = [1, 1, 1]} : vector<2x8x8xf32> to vector<2x1x8xf32>
    %273 = vector.extract_strided_slice %271 {offsets = [0, 7, 0], sizes = [2, 1, 1], strides = [1, 1, 1]} : vector<2x8x1xf32> to vector<2x1x1xf32>
    %274 = vector.extract_strided_slice %272 {offsets = [0, 0, 7], sizes = [2, 1, 1], strides = [1, 1, 1]} : vector<2x1x8xf32> to vector<2x1x1xf32>
    %275 = tpu.reciprocal %274 {approx = true} : vector<2x1x1xf32> -> vector<2x1x1xf32>
    %276 = arith.mulf %274, %275 : vector<2x1x1xf32>
    %cst_32 = arith.constant 2.000000e+00 : f32
    %277 = vector.broadcast %cst_32 : f32 to vector<2x1x1xf32>
    %278 = arith.subf %277, %276 : vector<2x1x1xf32>
    %279 = arith.mulf %275, %278 : vector<2x1x1xf32>
    %280 = arith.mulf %273, %279 : vector<2x1x1xf32>
    %281 = vector.extract_strided_slice %263 {offsets = [0, 0, 7], sizes = [2, 8, 1], strides = [1, 1, 1]} : vector<2x8x8xf32> to vector<2x8x1xf32>
    %c7_i32 = arith.constant 7 : i32
    %282 = vector.broadcast %c7_i32 : i32 to vector<1x8x1xi32>
    %283 = arith.cmpi eq, %54, %282 : vector<1x8x1xi32>
    %284 = vector.broadcast %280 : vector<2x1x1xf32> to vector<2x8x1xf32>
    %285 = arith.mulf %281, %284 : vector<2x8x1xf32>
    %286 = arith.subf %271, %285 : vector<2x8x1xf32>
    %287 = vector.shape_cast %283 : vector<1x8x1xi1> to vector<1x8x1xi1>
    %288 = vector.broadcast %287 : vector<1x8x1xi1> to vector<2x8x1xi1>
    %289 = vector.shape_cast %280 : vector<2x1x1xf32> to vector<2x1x1xf32>
    %290 = vector.broadcast %289 : vector<2x1x1xf32> to vector<2x8x1xf32>
    %291 = arith.select %288, %290, %286 : vector<2x8x1xi1>, vector<2x8x1xf32>
    %cst_33 = arith.constant dense<0xFF800000> : vector<2x1xf32>
    %292 = vector.multi_reduction <maximumf>, %291, %cst_33 [1] : vector<2x8x1xf32> to vector<2x1xf32>
    %293 = vector.shape_cast %292 : vector<2x1xf32> to vector<2x1x1xf32>
    %294 = vector.broadcast %293 : vector<2x1x1xf32> to vector<2x8x1xf32>
    %295 = arith.subf %291, %294 : vector<2x8x1xf32>
    %296 = math.exp %295 : vector<2x8x1xf32>
    %cst_34 = arith.constant dense<0.000000e+00> : vector<2x1xf32>
    %297 = vector.multi_reduction <add>, %296, %cst_34 [1] : vector<2x8x1xf32> to vector<2x1xf32>
    %298 = vector.shape_cast %297 : vector<2x1xf32> to vector<2x1x1xf32>
    %299 = tpu.reciprocal %298 {approx = true} : vector<2x1x1xf32> -> vector<2x1x1xf32>
    %300 = arith.mulf %298, %299 : vector<2x1x1xf32>
    %cst_35 = arith.constant 2.000000e+00 : f32
    %301 = vector.broadcast %cst_35 : f32 to vector<2x1x1xf32>
    %302 = arith.subf %301, %300 : vector<2x1x1xf32>
    %303 = arith.mulf %299, %302 : vector<2x1x1xf32>
    %304 = vector.broadcast %303 : vector<2x1x1xf32> to vector<2x8x1xf32>
    %305 = arith.mulf %296, %304 : vector<2x8x1xf32>
    %cst_36 = arith.constant dense<0.000000e+00> : vector<2x1x32xf32>
    %306 = tpu.matmul %305, %6, %cst_36 {dimension_numbers = #tpu.dot_dimension_numbers<[1], [1], [2], [2], [0, 0, 0, 2, 1, 2], [0], [0]>} : vector<2x8x1xf32>, vector<2x8x32xf32>, vector<2x1x32xf32> -> vector<2x1x32xf32>
    %307 = vector.shape_cast %306 : vector<2x1x32xf32> to vector<2x32xf32>
    %c0_37 = arith.constant 0 : index
    %c0_38 = arith.constant 0 : index
    %308 = vector.load %arg4[%c0_37, %c0_38] : memref<2x32xf32, #tpu.memory_space<vmem>>, vector<2x32xf32>
    tpu.vector_store %arg4[%c0_37, %c0_38], %307 {strides = array<i32>} : memref<2x32xf32, #tpu.memory_space<vmem>>, vector<2x32xf32>,
    return
  }
  func.func @transform_0(%arg0: i32) -> (i32, i32, i32) {
    %c0_i32 = arith.constant 0 : i32
    %c0_i32_0 = arith.constant 0 : i32
    %c0_i32_1 = arith.constant 0 : i32
    return %arg0, %c0_i32, %c0_i32_0 : i32, i32, i32
  }
  func.func @transform_1(%arg0: i32) -> (i32, i32, i32) {
    %c0_i32 = arith.constant 0 : i32
    %c0_i32_0 = arith.constant 0 : i32
    %c0_i32_1 = arith.constant 0 : i32
    return %arg0, %c0_i32, %c0_i32_0 : i32, i32, i32
  }
  func.func @transform_2(%arg0: i32) -> (i32, i32, i32) {
    %c0_i32 = arith.constant 0 : i32
    %c0_i32_0 = arith.constant 0 : i32
    %c0_i32_1 = arith.constant 0 : i32
    return %arg0, %c0_i32, %c0_i32_0 : i32, i32, i32
  }
  func.func @transform_3(%arg0: i32) -> (i32, i32) {
    %c0_i32 = arith.constant 0 : i32
    %c0_i32_0 = arith.constant 0 : i32
    return %arg0, %c0_i32 : i32, i32
  }
}

</mosaic_0001>

<bundles_post_ra>
// kernel: tpu_custom_call.1
= control target key start
LH: loop header
LB: loop body
LE: loop exit
PB: predicated region body
PF: predicated region fallthrough
CT: control target
= control target key end

     0   :  { %vm25_vm0 = vcmask 31744   ;;  %v1320_v2 = vmov 0.0   ;;  %s1676_s0 = inlined_call_operand.vmem [shape: f32[2,8,4], index: 0, kind: input, shape index: {}]   ;;  %s1677_s1 = inlined_call_operand.vmem [shape: f32[2,1,4], index: 1, kind: input, shape index: {}]   ;;  %s1678_s2 = inlined_call_operand.vmem [shape: f32[2,8,32], index: 2, kind: input, shape index: {}]   ;;  %s1679_s3 = inlined_call_operand.hbm [shape: f32[2,32], index: 3, kind: output, shape index: {}]  }
   0x1   :  { %v15_v0 = vld [vmem:[%s1676_s0] sm:$0xff]  ;;  %v16_v1 = vld [vmem:[%s1676_s0 + $0x8] sm:$0xff]  ;;  %1191 = vmatprep.subr.mxu0 %v1320_v2  ;;  %1196 = vmatprep.subr.mxu1 %v1320_v2 }
   0x2   :  { %v1372_v3 = vmul.f32 0.94280905, %v15_v0  ;;  %v1374_v4 = vmul.f32 0.94280905, %v16_v1 }
   0x3   :  { %8 = vsyncpa [#allocation3], 0  ;;  %vm1321_vm1 = vmmov 0   ;;  %v1322_v9 = vmov 0   ;;  %v173_v10 = vlaneseq  ;;  %vm218_vm3 = vcmask 64512   ;;  %s1326_s19 = smov 1  }
   0x4   :  { %1193 = vmatprep.mubr.msk.f32.mxu0 %vm1321_vm1, %v1320_v2  ;;  %1198 = vmatprep.mubr.msk.f32.mxu1 %vm1321_vm1, %v1320_v2  ;;  %v193_v5 = vmul.f32 %v1374_v4, %v1374_v4  ;;  %v192_v6 = vmul.f32 %v1372_v3, %v1372_v3  ;;  %v19_v61 = vld [vmem:[%s1677_s1] sm:$0x1]  ;;  %vm202_vm4 = vcmask 24576   ;;  %v1323_v1 = vmov 1   ;;  %s1327_s20 = smov 126   ;;  %s1329_s21 = smov 2  }
   0x5   :  { %1192 = vmatpush3.xpose.msk.msra.mxu0 %vm25_vm0, %v1372_v3  ;;  %1197 = vmatpush3.xpose.msk.msra.mxu1 %vm25_vm0, %v1374_v4  ;;  %v1396_v11 = vshrl.u32 %v173_v10, 7  ;;  %v212_v12 = vand.u32 127, %v173_v10  ;;  %v21_v63 = vmul.f32 0.94280905, %v19_v61  ;;  %s1330_s22 = smov 125   ;;  %s1332_s23 = smov 3  }
   0x6   :  { %1206 = vmatprep.subr.mxu1 %v1320_v2  ;;  %1201 = vmatprep.subr.mxu0 %v1320_v2  ;;  %v197_v7 = vsel %vm25_vm0, %v193_v5, 0.0  ;;  %v194_v8 = vsel %vm25_vm0, %v192_v6, 0.0  ;;  %v20_v5 = vld [vmem:[%s1677_s1 + $0x1] sm:$0x1]  ;;  %s1324_s1 = smov 127   ;;  %s1333_s24 = smov 124  }
   0x7   :  { %198 = vadd.xlane.f32.xlu0 %v197_v7  ;;  %1236 = vset.pattern.permute.xlu1 %v1322_v9  ;;  %vm213_vm2 = vcmp.eq.s32.totalorder %v1396_v11, %v212_v12  ;;  %v200_v0 = vmul.f32 %v21_v63, %v21_v63  ;;  %v22_v6 = vmul.f32 0.94280905, %v20_v5  ;;  %v1437_v7 = vsub.s32 0, %v1396_v11  ;;  %s1335_s25 = smov 4   ;;  %s1336_s26 = smov 123  }
   0x8   :  { %1194 = vmatmul.mubr.msk.f32.vlgmr.msra.gmra.mrb[0].mxu0 %vm25_vm0, %v1372_v3  ;;  %1199 = vmatmul.mubr.msk.f32.vlgmr.msra.gmra.mrb[0].mxu1 %vm25_vm0, %v1374_v4  ;;  %v273_v48 = vsel %vm213_vm2, 0.1, %v1320_v2  ;;  %vm298_vm5 = vcmp.eq.s32.totalorder %v1396_v11, 0  ;;  %vm367_vm6 = vcmp.eq.s32.totalorder %v1396_v11, 1  ;;  %vm452_vm7 = vcmp.eq.s32.totalorder %v1396_v11, 2  ;;  %s1338_s27 = smov 5  }
   0x9   :  { %1208 = vmatprep.mubr.msk.f32.mxu1 %vm1321_vm1, %v1320_v2  ;;  %1203 = vmatprep.mubr.msk.f32.mxu0 %vm1321_vm1, %v1320_v2  ;;  %v203_v2 = vsel %vm202_vm4, %v200_v0, 0.0  ;;  %vm537_vm8 = vcmp.eq.s32.totalorder %v1396_v11, 3  ;;  %vm622_vm9 = vcmp.eq.s32.totalorder %v1396_v11, 4  ;;  %vm707_vm10 = vcmp.eq.s32.totalorder %v1396_v11, 5  ;;  %s1339_s28 = smov 122   ;;  %s1340_s29 = smov 6  }
   0xa   :  { %1235 = vset.pattern.permute.xlu0 %v1322_v9  ;;  %v186_v9 = vrot.slane %v22_v6, %v1437_v7  ;;  %vm792_vm11 = vcmp.eq.s32.totalorder %v1396_v11, 6  ;;  %s1341_s30 = smov 121   ;;  %s1342_s4 = smov 7   ;;  %vm867_vm12 = vcmp.eq.s32.totalorder %v1396_v11, 7  ;;  %vm900_vm13 = vcmask 7168  }
   0xb   :  { %195 = vadd.xlane.f32.xlu0 %v194_v8  ;;  %v201_v8 = vmul.f32 %v22_v6, %v22_v6  ;;  %vm1158_vm14 = vcmask 1041409   ;;  %vm1161_vm15 = vcmask 254976  }
   0xc   :  { %v188_v12 = vmul.f32 %v186_v9, %v1374_v4  ;;  %v380_v9 = vsub.s32 1, %v1396_v11 }
   0xd   :  { %v206_v10 = vsel %vm202_vm4, %v201_v8, 0.0 }
  0x94   :  { %v1405_v25 = vpop.xlane.xlu0 %198 }
  0x98   :  { %v1407_v32 = vpop.xlane.xlu0 %195 }
  0xdb   :  { %v95_v13 = vpop.f32.mrb[0].mxu0  ;;  %v168_v14 = vpop.f32.mrb[0].mxu1 }
  0xdc   :  { %v216_v15 = vsel %vm213_vm2, %v95_v13, 0.0  ;;  %v217_v16 = vsel %vm213_vm2, %v168_v14, 0.0  ;;  %v1200_v17 = vpop.f32.mrb[1].mxu1  ;;  %v1195_v18 = vpop.f32.mrb[1].mxu0  ;;  %v235_v35 = vmul.f32 2.0, %v95_v13  ;;  %v236_v36 = vmul.f32 2.0, %v168_v14 }
  0xdd   :  { %v219_v19 = vsel %vm218_vm3, %v216_v15, 0.0  ;;  %v226_v20 = vsel %vm218_vm3, %v217_v16, 0.0  ;;  %v176_v13 = vrot.slane %v21_v63, %v1437_v7  ;;  %v189_v14 = vsel %vm25_vm0, %v188_v12, 0.0 }
  0xde   :  { %v220_v21 = vrot.slane %v219_v19, 4  ;;  %v227_v22 = vrot.slane %v226_v20, 4 }
  0xdf   :  { %v178_v15 = vmul.f32 %v176_v13, %v1372_v3 }
  0xe0   :  { %v221_v23 = vadd.f32 %v220_v21, %v219_v19  ;;  %v228_v24 = vadd.f32 %v227_v22, %v226_v20 }
  0xe1   :  { %v179_v16 = vsel %vm25_vm0, %v178_v15, 0.0  ;;  %v1325_v15 = vmov 2  }
  0xe2   :  { %v222_v26 = vrot.slane %v221_v23, 2  ;;  %v229_v27 = vrot.slane %v228_v24, 2 }
  0xe4   :  { %v230_v28 = vadd.f32 %v229_v27, %v228_v24  ;;  %v223_v29 = vadd.f32 %v222_v26, %v221_v23 }
  0xe6   :  { %v231_v30 = vrot.slane %v230_v28, 1  ;;  %v224_v31 = vrot.slane %v223_v29, 1 }
  0xe8   :  { %v232_v33 = vadd.f32 %v231_v30, %v230_v28  ;;  %v225_v34 = vadd.f32 %v224_v31, %v223_v29 }
  0xea   :  { %v234_v37 = vadd.f32 %v232_v33, %v1405_v25  ;;  %v233_v38 = vadd.f32 %v225_v34, %v1407_v32 }
  0xec   :  { %v238_v39 = vsub.f32 %v234_v37, %v236_v36  ;;  %v237_v40 = vsub.f32 %v233_v38, %v235_v35 }
  0xee   :  { %v240_v41 = vmax.f32 %v238_v39, 0.0  ;;  %v239_v42 = vmax.f32 %v237_v40, 0.0 }
  0xf0   :  { %v242_v43 = vsub.f32 0.0, %v240_v41  ;;  %v241_v44 = vsub.f32 0.0, %v239_v42 }
  0xf2   :  { %v245_v45 = vmul.f32 1.442695, %v242_v43  ;;  %v243_v46 = vmul.f32 1.442695, %v241_v44 }
  0xf4   :  { %1248 = vpow2.f32 %v245_v45 }
  0xf5   :  { %1250 = vpow2.f32 %v243_v46 }
  0xfe   :  { %v1249_v47 = vpop.eup %1248 }
  0xff   :  { %v1251_v49 = vpop.eup %1250  ;;  %v248_v50 = vmul.f32 1.5, %v1249_v47 }
 0x100   :  { %v247_v51 = vmul.f32 1.5, %v1251_v49 }
 0x101   :  { %v1414_v52 = vadd.f32 %v273_v48, %v248_v50 }
 0x102   :  { %v1416_v53 = vadd.f32 %v273_v48, %v247_v51 }
 0x103   :  { %306 = vperm.xlu0 %1235, %v1414_v52   ;;  %1252 = vrcp.f32 %v1414_v52 }
 0x104   :  { %1254 = vrcp.f32 %v1416_v53 }
 0x107   :  { %1237 = vset.pattern.permute.xlu0 %v1323_v1 }
 0x10d   :  { %v1253_v54 = vpop.eup %1252 }
 0x10e   :  { %v1255_v55 = vpop.eup %1254  ;;  %v279_v56 = vmul.f32 %v1253_v54, %v1414_v52 }
 0x10f   :  { %v278_v57 = vmul.f32 %v1255_v55, %v1416_v53 }
 0x110   :  { %v281_v58 = vsub.f32 2.0, %v279_v56 }
 0x111   :  { %v280_v60 = vsub.f32 2.0, %v278_v57 }
 0x112   :  { %v1423_v59 = vmul.f32 %v1253_v54, %v281_v58 }
 0x113   :  { %v1429_v62 = vmul.f32 %v1255_v55, %v280_v60 }
 0x114   :  { %291 = vperm.xlu1 %1236, %v1423_v59  }
 0x118   :  { %286 = vperm.xlu1 %1236, %v1429_v62  }
 0x11c   :  { %301 = vperm.xlu1 %1236, %v1416_v53  }
 0x120   :  { %1238 = vset.pattern.permute.xlu1 %v1323_v1 }
 0x122   :  { %204 = vadd.xlane.f32.xlu0 %v203_v2 }
 0x140   :  { %207 = vadd.xlane.f32.xlu1 %v206_v10 }
 0x144   :  { %190 = vadd.xlane.f32.xlu1 %v189_v14 }
 0x148   :  { %180 = vadd.xlane.f32.xlu1 %v179_v16 }
 0x182   :  { %v307_v20 = vpop.permute.xlu0 %306 }
 0x193   :  { %v292_v17 = vpop.permute.xlu1 %291 }
 0x194   :  { %v295_v18 = vmul.f32 %v292_v17, %v1414_v52 }
 0x196   :  { %v316_v19 = vrot.slane %v295_v18, %v1437_v7 }
 0x197   :  { %v287_v21 = vpop.permute.xlu1 %286 }
 0x198   :  { %v318_v22 = vmul.f32 %v316_v19, %v307_v20  ;;  %v294_v4 = vmul.f32 %v287_v21, %v1416_v53 }
 0x19a   :  { %v320_v23 = vsub.f32 %v1414_v52, %v318_v22  ;;  %v312_v3 = vrot.slane %v294_v4, %v1437_v7 }
 0x19b   :  { %v302_v24 = vpop.permute.xlu1 %301 }
 0x19c   :  { %v1453_v26 = vsel %vm298_vm5, %v316_v19, %v320_v23  ;;  %v317_v27 = vmul.f32 %v312_v3, %v302_v24 }
 0x19d   :  { %375 = vperm.xlu0 %1237, %v1453_v26   ;;  %1256 = vrcp.f32 %v1453_v26 }
 0x19e   :  { %v319_v28 = vsub.f32 %v1416_v53, %v317_v27 }
 0x1a0   :  { %v1460_v29 = vsel %vm298_vm5, %v312_v3, %v319_v28 }
 0x1a1   :  { %1258 = vrcp.f32 %v1460_v29 }
 0x1a7   :  { %v1257_v30 = vpop.eup %1256 }
 0x1a8   :  { %v342_v31 = vmul.f32 %v1257_v30, %v1453_v26 }
 0x1aa   :  { %v344_v33 = vsub.f32 2.0, %v342_v31 }
 0x1ab   :  { %v1259_v34 = vpop.eup %1258 }
 0x1ac   :  { %v346_v35 = vmul.f32 %v1257_v30, %v344_v33  ;;  %v341_v36 = vmul.f32 %v1259_v34, %v1460_v29 }
 0x1ae   :  { %361 = vrot.lane.b32.xlu1 %v346_v35, %s1324_s1  ;;  %v343_v37 = vsub.f32 2.0, %v341_v36 }
 0x1af   :  { %v205_v42 = vpop.xlane.xlu0 %204 }
 0x1b0   :  { %v345_v38 = vmul.f32 %v1259_v34, %v343_v37  ;;  %v252_v45 = vrot.slane %v205_v42, %v1437_v7 }
 0x1b2   :  { %359 = vrot.lane.b32.xlu1 %v345_v38, %s1324_s1  ;;  %v257_v49 = vadd.f32 %v252_v45, %v1407_v32 }
 0x1b6   :  { %354 = vperm.xlu1 %1238, %v346_v35  }
 0x1ba   :  { %349 = vperm.xlu1 %1238, %v345_v38  }
 0x1be   :  { %370 = vperm.xlu1 %1238, %v1460_v29  }
 0x1c2   :  { %1239 = vset.pattern.permute.xlu1 %v1325_v15 }
 0x1cd   :  { %v208_v39 = vpop.xlane.xlu1 %207 }
 0x1ce   :  { %v256_v41 = vrot.slane %v208_v39, %v1437_v7 }
 0x1d0   :  { %v258_v46 = vadd.f32 %v256_v41, %v1405_v25 }
 0x1d1   :  { %v191_v40 = vpop.xlane.xlu1 %190 }
 0x1d2   :  { %v260_v43 = vmul.f32 2.0, %v191_v40 }
 0x1d4   :  { %v262_v47 = vsub.f32 %v258_v46, %v260_v43  ;;  %v465_v46 = vsub.s32 2, %v1396_v11 }
 0x1d5   :  { %v181_v44 = vpop.xlane.xlu1 %180 }
 0x1d6   :  { %v259_v48 = vmul.f32 2.0, %v181_v44  ;;  %v264_v50 = vmax.f32 %v262_v47, 0.0  ;;  %v1328_v47 = vmov 3  }
 0x1d7   :  { %1240 = vset.pattern.permute.xlu0 %v1328_v47 }
 0x1d8   :  { %v261_v51 = vsub.f32 %v257_v49, %v259_v48  ;;  %v266_v54 = vsub.f32 0.0, %v264_v50 }
 0x1da   :  { %v263_v55 = vmax.f32 %v261_v51, 0.0  ;;  %v269_v56 = vmul.f32 1.442695, %v266_v54 }
 0x1dc   :  { %v265_v57 = vsub.f32 0.0, %v263_v55  ;;  %1260 = vpow2.f32 %v269_v56 }
 0x1de   :  { %v267_v58 = vmul.f32 1.442695, %v265_v57 }
 0x1e0   :  { %1262 = vpow2.f32 %v267_v58 }
 0x1e6   :  { %v1261_v60 = vpop.eup %1260 }
 0x1e7   :  { %v272_v61 = vmul.f32 1.5, %v1261_v60 }
 0x1e9   :  { %v297_v1 = vmul.f32 %v1423_v59, %v272_v61 }
 0x1ea   :  { %v1263_v63 = vpop.eup %1262 }
 0x1eb   :  { %v271_v0 = vmul.f32 1.5, %v1263_v63  ;;  %v332_v25 = vrot.slane %v297_v1, %v1437_v7 }
 0x1ed   :  { %v296_v2 = vmul.f32 %v1429_v62, %v271_v0  ;;  %v334_v32 = vmul.f32 %v332_v25, %v1414_v52 }
 0x1ef   :  { %v328_v5 = vrot.slane %v296_v2, %v1437_v7  ;;  %v336_v6 = vsub.f32 %v272_v61, %v334_v32 }
 0x1f1   :  { %v333_v8 = vmul.f32 %v328_v5, %v1416_v53  ;;  %v338_v10 = vsel %vm298_vm5, %v332_v25, %v336_v6 }
 0x1f3   :  { %v335_v13 = vsub.f32 %v271_v0, %v333_v8 }
 0x1f5   :  { %v337_v62 = vsel %vm298_vm5, %v328_v5, %v335_v13 }
 0x21c   :  { %v376_v19 = vpop.permute.xlu0 %375 }
 0x220   :  { %v362_v12 = vpop.permute.xlu1 %361 }
 0x221   :  { %v366_v14 = vmul.f32 %v362_v12, %v338_v10 }
 0x223   :  { %v401_v59 = vrot.slane %v366_v14, %v380_v9 }
 0x224   :  { %v360_v52 = vpop.permute.xlu1 %359 }
 0x225   :  { %v365_v16 = vmul.f32 %v360_v52, %v337_v62  ;;  %406 = vrot.lane.b32.xlu1 %v401_v59, %s1326_s19 }
 0x227   :  { %v397_v7 = vrot.slane %v365_v16, %v380_v9 }
 0x229   :  { %404 = vrot.lane.b32.xlu1 %v397_v7, %s1326_s19 }
 0x235   :  { %v355_v53 = vpop.permute.xlu1 %354 }
 0x236   :  { %v358_v17 = vmul.f32 %v355_v53, %v1453_v26 }
 0x238   :  { %v385_v18 = vrot.slane %v358_v17, %v380_v9 }
 0x239   :  { %v350_v27 = vpop.permute.xlu1 %349 }
 0x23a   :  { %v387_v20 = vmul.f32 %v385_v18, %v376_v19  ;;  %v357_v28 = vmul.f32 %v350_v27, %v1460_v29 }
 0x23c   :  { %v389_v21 = vsub.f32 %v1453_v26, %v387_v20  ;;  %v381_v30 = vrot.slane %v357_v28, %v380_v9 }
 0x23d   :  { %v371_v31 = vpop.permute.xlu1 %370 }
 0x23e   :  { %v1488_v22 = vsel %vm367_vm6, %v385_v18, %v389_v21  ;;  %v386_v33 = vmul.f32 %v381_v30, %v371_v31 }
 0x23f   :  { %1264 = vrcp.f32 %v1488_v22 }
 0x240   :  { %v388_v34 = vsub.f32 %v1460_v29, %v386_v33 }
 0x242   :  { %v1497_v35 = vsel %vm367_vm6, %v381_v30, %v388_v34 }
 0x243   :  { %1266 = vrcp.f32 %v1497_v35 }
 0x249   :  { %v1265_v4 = vpop.eup %1264 }
 0x24a   :  { %v427_v23 = vmul.f32 %v1265_v4, %v1488_v22 }
 0x24c   :  { %v429_v3 = vsub.f32 2.0, %v427_v23  ;;  %v1331_v23 = vmov 4  }
 0x24d   :  { %v1267_v36 = vpop.eup %1266 }
 0x24e   :  { %v431_v24 = vmul.f32 %v1265_v4, %v429_v3  ;;  %v426_v39 = vmul.f32 %v1267_v36, %v1497_v35 }
 0x250   :  { %446 = vrot.lane.b32.xlu1 %v431_v24, %s1327_s20  ;;  %v428_v42 = vsub.f32 2.0, %v426_v39 }
 0x252   :  { %v430_v43 = vmul.f32 %v1267_v36, %v428_v42 }
 0x297   :  { %v407_v37 = vpop.permute.xlu1 %406 }
 0x298   :  { %v411_v38 = vmul.f32 %v407_v37, %v1453_v26 }
 0x29a   :  { %416 = vrot.lane.b32.xlu1 %v411_v38, %s1324_s1 }
 0x29b   :  { %v405_v40 = vpop.permute.xlu1 %404 }
 0x29c   :  { %v410_v41 = vmul.f32 %v405_v40, %v1460_v29 }
 0x29e   :  { %414 = vrot.lane.b32.xlu1 %v410_v41, %s1324_s1 }
 0x2a2   :  { %444 = vrot.lane.b32.xlu1 %v430_v43, %s1327_s20 }
 0x2a6   :  { %439 = vperm.xlu1 %1239, %v431_v24  }
 0x2aa   :  { %434 = vperm.xlu1 %1239, %v430_v43  }
 0x2ae   :  { %460 = vperm.xlu1 %1239, %v1488_v22  }
 0x2b2   :  { %455 = vperm.xlu1 %1239, %v1497_v35  }
 0x2b6   :  { %1241 = vset.pattern.permute.xlu1 %v1328_v47 }
 0x2c2   :  { %v447_v26 = vpop.permute.xlu1 %446 }
 0x30c   :  { %v417_v44 = vpop.permute.xlu1 %416 }
 0x30d   :  { %v421_v45 = vsub.f32 %v338_v10, %v417_v44 }
 0x30f   :  { %v423_v29 = vsel %vm367_vm6, %v401_v59, %v421_v45 }
 0x310   :  { %v415_v48 = vpop.permute.xlu1 %414  ;;  %v451_v49 = vmul.f32 %v447_v26, %v423_v29 }
 0x311   :  { %v420_v50 = vsub.f32 %v337_v62, %v415_v48 }
 0x312   :  { %v486_v51 = vrot.slane %v451_v49, %v465_v46 }
 0x313   :  { %v422_v54 = vsel %vm367_vm6, %v397_v7, %v420_v50 }
 0x314   :  { %491 = vrot.lane.b32.xlu0 %v486_v51, %s1329_s21  ;;  %v445_v55 = vpop.permute.xlu1 %444 }
 0x315   :  { %v450_v56 = vmul.f32 %v445_v55, %v422_v54 }
 0x317   :  { %v482_v57 = vrot.slane %v450_v56, %v465_v46 }
 0x319   :  { %489 = vrot.lane.b32.xlu1 %v482_v57, %s1329_s21 }
 0x325   :  { %v440_v58 = vpop.permute.xlu1 %439 }
 0x326   :  { %v443_v61 = vmul.f32 %v440_v58, %v1488_v22 }
 0x328   :  { %v470_v0 = vrot.slane %v443_v61, %v465_v46 }
 0x329   :  { %v435_v60 = vpop.permute.xlu1 %434 }
 0x32a   :  { %v442_v1 = vmul.f32 %v435_v60, %v1497_v35 }
 0x32c   :  { %v466_v32 = vrot.slane %v442_v1, %v465_v46 }
 0x32d   :  { %v461_v63 = vpop.permute.xlu1 %460 }
 0x32e   :  { %v472_v25 = vmul.f32 %v470_v0, %v461_v63 }
 0x330   :  { %v474_v5 = vsub.f32 %v1488_v22, %v472_v25  ;;  %v635_v25 = vsub.s32 4, %v1396_v11 }
 0x331   :  { %v456_v2 = vpop.permute.xlu1 %455 }
 0x332   :  { %v471_v6 = vmul.f32 %v466_v32, %v456_v2  ;;  %v1519_v8 = vsel %vm452_vm7, %v470_v0, %v474_v5 }
 0x333   :  { %1268 = vrcp.f32 %v1519_v8 }
 0x334   :  { %v473_v9 = vsub.f32 %v1497_v35, %v471_v6 }
 0x336   :  { %v1525_v10 = vsel %vm452_vm7, %v466_v32, %v473_v9  ;;  %v1334_v32 = vmov 5  }
 0x337   :  { %1270 = vrcp.f32 %v1525_v10 }
 0x33d   :  { %v1269_v12 = vpop.eup %1268 }
 0x33e   :  { %v512_v13 = vmul.f32 %v1269_v12, %v1519_v8 }
 0x340   :  { %v514_v62 = vsub.f32 2.0, %v512_v13 }
 0x341   :  { %v1271_v14 = vpop.eup %1270 }
 0x342   :  { %v511_v52 = vmul.f32 %v1271_v14, %v1525_v10  ;;  %v516_v7 = vmul.f32 %v1269_v12, %v514_v62 }
 0x344   :  { %v513_v17 = vsub.f32 2.0, %v511_v52 }
 0x346   :  { %v515_v18 = vmul.f32 %v1271_v14, %v513_v17 }
 0x386   :  { %v492_v59 = vpop.permute.xlu0 %491 }
 0x387   :  { %v496_v15 = vmul.f32 %v492_v59, %v1488_v22  ;;  %v550_v22 = vsub.s32 3, %v1396_v11 }
 0x389   :  { %501 = vrot.lane.b32.xlu0 %v496_v15, %s1327_s20 }
 0x38b   :  { %v490_v16 = vpop.permute.xlu1 %489 }
 0x38c   :  { %v495_v53 = vmul.f32 %v490_v16, %v1497_v35 }
 0x38d   :  { %531 = vrot.lane.b32.xlu0 %v516_v7, %s1330_s22 }
 0x38e   :  { %499 = vrot.lane.b32.xlu1 %v495_v53, %s1327_s20 }
 0x391   :  { %524 = vperm.xlu0 %1240, %v516_v7  }
 0x392   :  { %529 = vrot.lane.b32.xlu1 %v515_v18, %s1330_s22 }
 0x395   :  { %540 = vperm.xlu0 %1240, %v1525_v10  }
 0x396   :  { %519 = vperm.xlu1 %1241, %v515_v18  }
 0x399   :  { %1243 = vset.pattern.permute.xlu0 %v1331_v23 }
 0x39a   :  { %545 = vperm.xlu1 %1241, %v1519_v8  }
 0x39e   :  { %1242 = vset.pattern.permute.xlu1 %v1331_v23 }
 0x3fb   :  { %v502_v19 = vpop.permute.xlu0 %501 }
 0x3fc   :  { %v506_v20 = vsub.f32 %v423_v29, %v502_v19 }
 0x3fe   :  { %v508_v21 = vsel %vm452_vm7, %v486_v51, %v506_v20 }
 0x3ff   :  { %v532_v4 = vpop.permute.xlu0 %531 }
 0x400   :  { %v536_v3 = vmul.f32 %v532_v4, %v508_v21  ;;  %v500_v24 = vpop.permute.xlu1 %499 }
 0x401   :  { %v505_v27 = vsub.f32 %v422_v54, %v500_v24 }
 0x402   :  { %v571_v28 = vrot.slane %v536_v3, %v550_v22 }
 0x403   :  { %v507_v30 = vsel %vm452_vm7, %v482_v57, %v505_v27 }
 0x404   :  { %576 = vrot.lane.b32.xlu1 %v571_v28, %s1332_s23  ;;  %v530_v31 = vpop.permute.xlu1 %529 }
 0x405   :  { %v535_v33 = vmul.f32 %v530_v31, %v507_v30 }
 0x407   :  { %v567_v34 = vrot.slane %v535_v33, %v550_v22 }
 0x409   :  { %574 = vrot.lane.b32.xlu0 %v567_v34, %s1332_s23 }
 0x410   :  { %v525_v35 = vpop.permute.xlu0 %524 }
 0x411   :  { %v528_v37 = vmul.f32 %v525_v35, %v1519_v8 }
 0x413   :  { %v555_v40 = vrot.slane %v528_v37, %v550_v22 }
 0x414   :  { %v541_v43 = vpop.permute.xlu0 %540 }
 0x415   :  { %v520_v36 = vpop.permute.xlu1 %519 }
 0x416   :  { %v527_v38 = vmul.f32 %v520_v36, %v1525_v10 }
 0x418   :  { %v551_v42 = vrot.slane %v527_v38, %v550_v22 }
 0x419   :  { %v546_v39 = vpop.permute.xlu1 %545 }
 0x41a   :  { %v557_v41 = vmul.f32 %v555_v40, %v546_v39  ;;  %v556_v44 = vmul.f32 %v551_v42, %v541_v43  ;;  %v1337_v43 = vmov 6  }
 0x41c   :  { %v559_v26 = vsub.f32 %v1519_v8, %v557_v41  ;;  %v558_v46 = vsub.f32 %v1525_v10, %v556_v44  ;;  %v720_v41 = vsub.s32 5, %v1396_v11 }
 0x41e   :  { %v1549_v45 = vsel %vm537_vm8, %v555_v40, %v559_v26  ;;  %v1555_v29 = vsel %vm537_vm8, %v551_v42, %v558_v46 }
 0x41f   :  { %1272 = vrcp.f32 %v1549_v45 }
 0x420   :  { %1274 = vrcp.f32 %v1555_v29 }
 0x429   :  { %v1273_v47 = vpop.eup %1272 }
 0x42a   :  { %v597_v48 = vmul.f32 %v1273_v47, %v1549_v45  ;;  %v1275_v49 = vpop.eup %1274 }
 0x42b   :  { %v596_v55 = vmul.f32 %v1275_v49, %v1555_v29 }
 0x42c   :  { %v599_v54 = vsub.f32 2.0, %v597_v48 }
 0x42d   :  { %v598_v60 = vsub.f32 2.0, %v596_v55 }
 0x42e   :  { %v601_v57 = vmul.f32 %v1273_v47, %v599_v54 }
 0x42f   :  { %v600_v61 = vmul.f32 %v1275_v49, %v598_v60 }
 0x476   :  { %v577_v50 = vpop.permute.xlu1 %576 }
 0x477   :  { %v581_v51 = vmul.f32 %v577_v50, %v1519_v8 }
 0x479   :  { %586 = vrot.lane.b32.xlu1 %v581_v51, %s1330_s22 }
 0x47b   :  { %v575_v56 = vpop.permute.xlu0 %574 }
 0x47c   :  { %v580_v58 = vmul.f32 %v575_v56, %v1525_v10 }
 0x47d   :  { %616 = vrot.lane.b32.xlu1 %v601_v57, %s1333_s24 }
 0x47e   :  { %584 = vrot.lane.b32.xlu0 %v580_v58, %s1330_s22 }
 0x481   :  { %609 = vperm.xlu1 %1242, %v601_v57  }
 0x482   :  { %614 = vrot.lane.b32.xlu0 %v600_v61, %s1333_s24 }
 0x485   :  { %630 = vperm.xlu1 %1242, %v1549_v45  }
 0x486   :  { %604 = vperm.xlu0 %1243, %v600_v61  }
 0x489   :  { %625 = vperm.xlu1 %1242, %v1555_v29  }
 0x48a   :  { %1244 = vset.pattern.permute.xlu0 %v1334_v32 }
 0x48d   :  { %1245 = vset.pattern.permute.xlu1 %v1334_v32 }
 0x4eb   :  { %v587_v63 = vpop.permute.xlu1 %586 }
 0x4ec   :  { %v591_v0 = vsub.f32 %v508_v21, %v587_v63 }
 0x4ee   :  { %v593_v1 = vsel %vm537_vm8, %v571_v28, %v591_v0 }
 0x4ef   :  { %v617_v2 = vpop.permute.xlu1 %616 }
 0x4f0   :  { %v621_v5 = vmul.f32 %v617_v2, %v593_v1  ;;  %v585_v6 = vpop.permute.xlu0 %584 }
 0x4f1   :  { %v590_v8 = vsub.f32 %v507_v30, %v585_v6 }
 0x4f2   :  { %v656_v9 = vrot.slane %v621_v5, %v635_v25 }
 0x4f3   :  { %v592_v10 = vsel %vm537_vm8, %v567_v34, %v590_v8 }
 0x4f4   :  { %v615_v12 = vpop.permute.xlu0 %614  ;;  %661 = vrot.lane.b32.xlu0 %v656_v9, %s1335_s25 }
 0x4f5   :  { %v620_v13 = vmul.f32 %v615_v12, %v592_v10 }
 0x4f7   :  { %v652_v14 = vrot.slane %v620_v13, %v635_v25 }
 0x4f9   :  { %659 = vrot.lane.b32.xlu1 %v652_v14, %s1335_s25 }
 0x500   :  { %v610_v59 = vpop.permute.xlu1 %609 }
 0x501   :  { %v613_v15 = vmul.f32 %v610_v59, %v1549_v45 }
 0x503   :  { %v640_v52 = vrot.slane %v613_v15, %v635_v25 }
 0x504   :  { %v631_v16 = vpop.permute.xlu1 %630 }
 0x505   :  { %v605_v62 = vpop.permute.xlu0 %604  ;;  %v642_v53 = vmul.f32 %v640_v52, %v631_v16 }
 0x506   :  { %v612_v7 = vmul.f32 %v605_v62, %v1555_v29 }
 0x507   :  { %v644_v19 = vsub.f32 %v1549_v45, %v642_v53  ;;  %v805_v53 = vsub.s32 6, %v1396_v11 }
 0x508   :  { %v636_v17 = vrot.slane %v612_v7, %v635_v25  ;;  %v626_v18 = vpop.permute.xlu1 %625 }
 0x509   :  { %v1579_v21 = vsel %vm622_vm9, %v640_v52, %v644_v19 }
 0x50a   :  { %v641_v20 = vmul.f32 %v636_v17, %v626_v18  ;;  %1276 = vrcp.f32 %v1579_v21 }
 0x50c   :  { %v643_v22 = vsub.f32 %v1555_v29, %v641_v20 }
 0x50e   :  { %v1585_v4 = vsel %vm622_vm9, %v636_v17, %v643_v22 }
 0x50f   :  { %1278 = vrcp.f32 %v1585_v4 }
 0x514   :  { %v1277_v23 = vpop.eup %1276 }
 0x515   :  { %v682_v3 = vmul.f32 %v1277_v23, %v1579_v21 }
 0x517   :  { %v684_v30 = vsub.f32 2.0, %v682_v3 }
 0x519   :  { %v1279_v24 = vpop.eup %1278  ;;  %v686_v34 = vmul.f32 %v1277_v23, %v684_v30 }
 0x51a   :  { %v681_v31 = vmul.f32 %v1279_v24, %v1585_v4 }
 0x51c   :  { %v683_v36 = vsub.f32 2.0, %v681_v31 }
 0x51e   :  { %v685_v37 = vmul.f32 %v1279_v24, %v683_v36 }
 0x566   :  { %v662_v27 = vpop.permute.xlu0 %661 }
 0x567   :  { %v666_v28 = vmul.f32 %v662_v27, %v1549_v45 }
 0x569   :  { %671 = vrot.lane.b32.xlu0 %v666_v28, %s1333_s24 }
 0x56b   :  { %v660_v33 = vpop.permute.xlu1 %659 }
 0x56c   :  { %v665_v35 = vmul.f32 %v660_v33, %v1555_v29 }
 0x56d   :  { %701 = vrot.lane.b32.xlu0 %v686_v34, %s1336_s26 }
 0x56e   :  { %669 = vrot.lane.b32.xlu1 %v665_v35, %s1333_s24 }
 0x571   :  { %694 = vperm.xlu0 %1244, %v686_v34  }
 0x572   :  { %699 = vrot.lane.b32.xlu1 %v685_v37, %s1336_s26 }
 0x575   :  { %710 = vperm.xlu0 %1244, %v1585_v4  }
 0x576   :  { %689 = vperm.xlu1 %1245, %v685_v37  }
 0x579   :  { %1247 = vset.pattern.permute.xlu0 %v1337_v43 }
 0x57a   :  { %715 = vperm.xlu1 %1245, %v1579_v21  }
 0x57e   :  { %1246 = vset.pattern.permute.xlu1 %v1337_v43 }
 0x5db   :  { %v672_v38 = vpop.permute.xlu0 %671 }
 0x5dc   :  { %v676_v39 = vsub.f32 %v593_v1, %v672_v38 }
 0x5de   :  { %v678_v40 = vsel %vm622_vm9, %v656_v9, %v676_v39 }
 0x5df   :  { %v702_v42 = vpop.permute.xlu0 %701 }
 0x5e0   :  { %v706_v26 = vmul.f32 %v702_v42, %v678_v40  ;;  %v670_v44 = vpop.permute.xlu1 %669 }
 0x5e1   :  { %v675_v45 = vsub.f32 %v592_v10, %v670_v44 }
 0x5e2   :  { %v741_v46 = vrot.slane %v706_v26, %v720_v41 }
 0x5e3   :  { %v677_v29 = vsel %vm622_vm9, %v652_v14, %v675_v45 }
 0x5e4   :  { %746 = vrot.lane.b32.xlu1 %v741_v46, %s1338_s27  ;;  %v700_v47 = vpop.permute.xlu1 %699 }
 0x5e5   :  { %v705_v48 = vmul.f32 %v700_v47, %v677_v29 }
 0x5e7   :  { %v737_v49 = vrot.slane %v705_v48, %v720_v41 }
 0x5e9   :  { %744 = vrot.lane.b32.xlu0 %v737_v49, %s1338_s27 }
 0x5f0   :  { %v695_v50 = vpop.permute.xlu0 %694 }
 0x5f1   :  { %v698_v54 = vmul.f32 %v695_v50, %v1579_v21 }
 0x5f3   :  { %v725_v57 = vrot.slane %v698_v54, %v720_v41 }
 0x5f4   :  { %v711_v61 = vpop.permute.xlu0 %710 }
 0x5f5   :  { %v690_v51 = vpop.permute.xlu1 %689 }
 0x5f6   :  { %v697_v55 = vmul.f32 %v690_v51, %v1585_v4 }
 0x5f8   :  { %v721_v60 = vrot.slane %v697_v55, %v720_v41 }
 0x5f9   :  { %v716_v56 = vpop.permute.xlu1 %715 }
 0x5fa   :  { %v727_v58 = vmul.f32 %v725_v57, %v716_v56  ;;  %v726_v0 = vmul.f32 %v721_v60, %v711_v61 }
 0x5fc   :  { %v729_v63 = vsub.f32 %v1579_v21, %v727_v58  ;;  %v728_v25 = vsub.f32 %v1585_v4, %v726_v0 }
 0x5fe   :  { %v1609_v1 = vsel %vm707_vm10, %v725_v57, %v729_v63  ;;  %v1615_v2 = vsel %vm707_vm10, %v721_v60, %v728_v25  ;;  %v870_v57 = vsub.s32 7, %v1396_v11 }
 0x5ff   :  { %1280 = vrcp.f32 %v1609_v1 }
 0x600   :  { %1282 = vrcp.f32 %v1615_v2 }
 0x609   :  { %v1281_v32 = vpop.eup %1280 }
 0x60a   :  { %v767_v5 = vmul.f32 %v1281_v32, %v1609_v1  ;;  %v1283_v6 = vpop.eup %1282 }
 0x60b   :  { %v766_v12 = vmul.f32 %v1283_v6, %v1615_v2 }
 0x60c   :  { %v769_v10 = vsub.f32 2.0, %v767_v5 }
 0x60d   :  { %v768_v15 = vsub.f32 2.0, %v766_v12  ;;  %v23_v12 = vld [vmem:[%s1678_s2] sm:$0xff] }
 0x60e   :  { %v771_v14 = vmul.f32 %v1281_v32, %v769_v10  ;;  %v24_v10 = vld [vmem:[%s1678_s2 + $0x8] sm:$0xff]  ;;  %1202 = vmatpush3.msra.mxu0 %v23_v12  ;;  %s1343_s2 = smov [#allocation2]  }
 0x60f   :  { %v770_v62 = vmul.f32 %v1283_v6, %v768_v15  ;;  %1207 = vmatpush3.msra.mxu1 %v24_v10  ;;  %s1169_s9 = sshll.u32 %s1343_s2, 4  ;;  %s1170_s9 = int_to_ptr.vmem [resolvable:$true] %s1169_s9 }
 0x610   :  { %s1296_s10 = scalar_lea.vmem %s1170_s9, 32  ;;  %p1301_p1 = scmp.lt.s32.totalorder %s1170_s9, %s1170_s9 }
 0x611   :  { %p1297_p0 = scmp.ne.s32.totalorder %s1170_s9, %s1296_s10  ;;  %p1302_p2 = scmp.lt.s32.totalorder %s1296_s10, %s1296_s10 }
 0x613   :  { %p1303_p3 = por %p1302_p2, %p1301_p1 }
 0x615   :  { %p1304_p4 = pnand %p1303_p3, %p1297_p0 }
 0x656   :  { %v747_v8 = vpop.permute.xlu1 %746 }
 0x657   :  { %v751_v9 = vmul.f32 %v747_v8, %v1579_v21 }
 0x659   :  { %756 = vrot.lane.b32.xlu1 %v751_v9, %s1336_s26 }
 0x65b   :  { %v745_v13 = vpop.permute.xlu0 %744 }
 0x65c   :  { %v750_v59 = vmul.f32 %v745_v13, %v1585_v4 }
 0x65d   :  { %786 = vrot.lane.b32.xlu1 %v771_v14, %s1339_s28 }
 0x65e   :  { %754 = vrot.lane.b32.xlu0 %v750_v59, %s1336_s26 }
 0x661   :  { %779 = vperm.xlu1 %1246, %v771_v14  }
 0x662   :  { %784 = vrot.lane.b32.xlu0 %v770_v62, %s1339_s28 }
 0x665   :  { %800 = vperm.xlu1 %1246, %v1609_v1  }
 0x666   :  { %774 = vperm.xlu0 %1247, %v770_v62  }
 0x669   :  { %795 = vperm.xlu1 %1246, %v1615_v2  }
 0x6cb   :  { %v757_v52 = vpop.permute.xlu1 %756 }
 0x6cc   :  { %v761_v16 = vsub.f32 %v678_v40, %v757_v52 }
 0x6ce   :  { %v763_v7 = vsel %vm707_vm10, %v741_v46, %v761_v16 }
 0x6cf   :  { %v787_v17 = vpop.permute.xlu1 %786 }
 0x6d0   :  { %v791_v18 = vmul.f32 %v787_v17, %v763_v7  ;;  %v755_v19 = vpop.permute.xlu0 %754 }
 0x6d1   :  { %v760_v20 = vsub.f32 %v677_v29, %v755_v19 }
 0x6d2   :  { %v826_v21 = vrot.slane %v791_v18, %v805_v53 }
 0x6d3   :  { %v762_v22 = vsel %vm707_vm10, %v737_v49, %v760_v20 }
 0x6d4   :  { %v785_v4 = vpop.permute.xlu0 %784  ;;  %831 = vrot.lane.b32.xlu0 %v826_v21, %s1340_s29 }
 0x6d5   :  { %v790_v23 = vmul.f32 %v785_v4, %v762_v22 }
 0x6d7   :  { %v822_v3 = vrot.slane %v790_v23, %v805_v53 }
 0x6d9   :  { %829 = vrot.lane.b32.xlu1 %v822_v3, %s1340_s29 }
 0x6e0   :  { %v780_v24 = vpop.permute.xlu1 %779 }
 0x6e1   :  { %v783_v27 = vmul.f32 %v780_v24, %v1609_v1 }
 0x6e3   :  { %v810_v30 = vrot.slane %v783_v27, %v805_v53 }
 0x6e4   :  { %v801_v31 = vpop.permute.xlu1 %800 }
 0x6e5   :  { %v775_v28 = vpop.permute.xlu0 %774  ;;  %v812_v34 = vmul.f32 %v810_v30, %v801_v31 }
 0x6e6   :  { %v782_v33 = vmul.f32 %v775_v28, %v1615_v2 }
 0x6e7   :  { %v814_v37 = vsub.f32 %v1609_v1, %v812_v34 }
 0x6e8   :  { %v806_v35 = vrot.slane %v782_v33, %v805_v53  ;;  %v796_v36 = vpop.permute.xlu1 %795 }
 0x6e9   :  { %v818_v39 = vsel %vm792_vm11, %v810_v30, %v814_v37 }
 0x6ea   :  { %v811_v38 = vmul.f32 %v806_v35, %v796_v36  ;;  %1284 = vrcp.f32 %v818_v39 }
 0x6ec   :  { %v813_v40 = vsub.f32 %v1615_v2, %v811_v38 }
 0x6ee   :  { %v817_v41 = vsel %vm792_vm11, %v806_v35, %v813_v40 }
 0x6ef   :  { %1286 = vrcp.f32 %v817_v41 }
 0x6f4   :  { %v1285_v42 = vpop.eup %1284 }
 0x6f5   :  { %v852_v43 = vmul.f32 %v1285_v42, %v818_v39 }
 0x6f7   :  { %v854_v46 = vsub.f32 2.0, %v852_v43 }
 0x6f9   :  { %v1287_v26 = vpop.eup %1286  ;;  %v856_v48 = vmul.f32 %v1285_v42, %v854_v46 }
 0x6fa   :  { %v851_v29 = vmul.f32 %v1287_v26, %v817_v41 }
 0x6fc   :  { %v853_v50 = vsub.f32 2.0, %v851_v29 }
 0x6fe   :  { %v855_v51 = vmul.f32 %v1287_v26, %v853_v50 }
 0x746   :  { %v832_v44 = vpop.permute.xlu0 %831 }
 0x747   :  { %v836_v45 = vmul.f32 %v832_v44, %v1609_v1 }
 0x749   :  { %841 = vrot.lane.b32.xlu0 %v836_v45, %s1339_s28 }
 0x74b   :  { %v830_v47 = vpop.permute.xlu1 %829 }
 0x74c   :  { %v835_v49 = vmul.f32 %v830_v47, %v1615_v2 }
 0x74d   :  { %861 = vrot.lane.b32.xlu0 %v856_v48, %s1341_s30 }
 0x74e   :  { %839 = vrot.lane.b32.xlu1 %v835_v49, %s1339_s28 }
 0x752   :  { %859 = vrot.lane.b32.xlu1 %v855_v51, %s1341_s30 }
 0x7bb   :  { %v842_v54 = vpop.permute.xlu0 %841 }
 0x7bc   :  { %v846_v55 = vsub.f32 %v763_v7, %v842_v54 }
 0x7be   :  { %v848_v56 = vsel %vm792_vm11, %v826_v21, %v846_v55 }
 0x7bf   :  { %v862_v58 = vpop.permute.xlu0 %861 }
 0x7c0   :  { %v866_v60 = vmul.f32 %v862_v58, %v848_v56  ;;  %v840_v61 = vpop.permute.xlu1 %839 }
 0x7c1   :  { %v845_v63 = vsub.f32 %v762_v22, %v840_v61 }
 0x7c2   :  { %v875_v0 = vrot.slane %v866_v60, %v870_v57 }
 0x7c3   :  { %v847_v1 = vsel %vm792_vm11, %v822_v3, %v845_v63 }
 0x7c4   :  { %880 = vrot.lane.b32.xlu0 %v875_v0, %s1342_s4  ;;  %v860_v25 = vpop.permute.xlu1 %859 }
 0x7c5   :  { %v865_v2 = vmul.f32 %v860_v25, %v847_v1 }
 0x7c7   :  { %v871_v32 = vrot.slane %v865_v2, %v870_v57 }
 0x7c9   :  { %878 = vrot.lane.b32.xlu1 %v871_v32, %s1342_s4 }
 0x836   :  { %v881_v5 = vpop.permute.xlu0 %880 }
 0x837   :  { %v885_v6 = vmul.f32 %v881_v5, %v818_v39 }
 0x839   :  { %890 = vrot.lane.b32.xlu0 %v885_v6, %s1341_s30 }
 0x83b   :  { %v879_v8 = vpop.permute.xlu1 %878 }
 0x83c   :  { %v884_v9 = vmul.f32 %v879_v8, %v817_v41 }
 0x83e   :  { %888 = vrot.lane.b32.xlu1 %v884_v9, %s1341_s30 }
 0x8ab   :  { %v891_v13 = vpop.permute.xlu0 %890 }
 0x8ac   :  { %v895_v14 = vsub.f32 %v848_v56, %v891_v13 }
 0x8ae   :  { %v899_v59 = vsel %vm867_vm12, %v875_v0, %v895_v14 }
 0x8af   :  { %v908_v15 = vsel %vm900_vm13, %v899_v59, -inf }
 0x8b0   :  { %v909_v62 = vrot.slane %v908_v15, 4  ;;  %v889_v52 = vpop.permute.xlu1 %888 }
 0x8b1   :  { %v894_v16 = vsub.f32 %v847_v1, %v889_v52 }
 0x8b2   :  { %v910_v7 = vmax.f32 %v908_v15, %v909_v62 }
 0x8b3   :  { %v898_v53 = vsel %vm867_vm12, %v871_v32, %v894_v16 }
 0x8b4   :  { %v911_v17 = vrot.slane %v910_v7, 2  ;;  %v901_v18 = vsel %vm900_vm13, %v898_v53, -inf }
 0x8b5   :  { %v902_v19 = vrot.slane %v901_v18, 4 }
 0x8b6   :  { %v912_v20 = vmax.f32 %v910_v7, %v911_v17 }
 0x8b7   :  { %v903_v21 = vmax.f32 %v901_v18, %v902_v19 }
 0x8b8   :  { %v913_v22 = vrot.slane %v912_v20, 1 }
 0x8b9   :  { %v904_v4 = vrot.slane %v903_v21, 2 }
 0x8ba   :  { %v914_v11 = vmax.f32 %v912_v20, %v913_v22 }
 0x8bb   :  { %v905_v23 = vmax.f32 %v903_v21, %v904_v4 }
 0x8bc   :  { %v916_v3 = vsub.f32 %v899_v59, %v914_v11 }
 0x8bd   :  { %v906_v24 = vrot.slane %v905_v23, 1 }
 0x8be   :  { %v919_v27 = vmul.f32 1.442695, %v916_v3 }
 0x8bf   :  { %v907_v28 = vmax.f32 %v905_v23, %v906_v24 }
 0x8c0   :  { %1288 = vpow2.f32 %v919_v27 }
 0x8c1   :  { %v915_v30 = vsub.f32 %v898_v53, %v907_v28 }
 0x8c3   :  { %v917_v31 = vmul.f32 1.442695, %v915_v30 }
 0x8c5   :  { %1290 = vpow2.f32 %v917_v31 }
 0x8ca   :  { %v1289_v33 = vpop.eup %1288 }
 0x8cb   :  { %v928_v34 = vsel %vm900_vm13, %v1289_v33, 0.0 }
 0x8cc   :  { %v929_v35 = vrot.slane %v928_v34, 4 }
 0x8ce   :  { %v930_v36 = vadd.f32 %v929_v35, %v928_v34 }
 0x8cf   :  { %v1291_v37 = vpop.eup %1290 }
 0x8d0   :  { %v931_v38 = vrot.slane %v930_v36, 2  ;;  %v921_v39 = vsel %vm900_vm13, %v1291_v37, 0.0 }
 0x8d1   :  { %v922_v40 = vrot.slane %v921_v39, 4 }
 0x8d2   :  { %v932_v41 = vadd.f32 %v931_v38, %v930_v36 }
 0x8d3   :  { %v923_v42 = vadd.f32 %v922_v40, %v921_v39 }
 0x8d4   :  { %v933_v43 = vrot.slane %v932_v41, 1 }
 0x8d5   :  { %v924_v26 = vrot.slane %v923_v42, 2 }
 0x8d6   :  { %v934_v44 = vadd.f32 %v933_v43, %v932_v41 }
 0x8d7   :  { %v925_v45 = vadd.f32 %v924_v26, %v923_v42 }
 0x8d8   :  { %1292 = vrcp.f32 %v934_v44 }
 0x8d9   :  { %v926_v46 = vrot.slane %v925_v45, 1 }
 0x8db   :  { %v927_v29 = vadd.f32 %v926_v46, %v925_v45 }
 0x8dd   :  { %1294 = vrcp.f32 %v927_v29 }
 0x8e2   :  { %v1293_v47 = vpop.eup %1292 }
 0x8e3   :  { %v938_v48 = vmul.f32 %v1293_v47, %v934_v44 }
 0x8e5   :  { %v940_v49 = vsub.f32 2.0, %v938_v48 }
 0x8e7   :  { %v1295_v50 = vpop.eup %1294  ;;  %v942_v51 = vmul.f32 %v1293_v47, %v940_v49 }
 0x8e8   :  { %v937_v54 = vmul.f32 %v1295_v50, %v927_v29 }
 0x8e9   :  { %v944_v55 = vmul.f32 %v1289_v33, %v942_v51 }
 0x8ea   :  { %v939_v56 = vsub.f32 2.0, %v937_v54 }
 0x8eb   :  { %1050 = vxpose.xlu0.b32.start.end [1/1] (short) (narrow) %v944_v55, 8 }
 0x8ec   :  { %v941_v57 = vmul.f32 %v1295_v50, %v939_v56 }
 0x8ee   :  { %v943_v58 = vmul.f32 %v1291_v37, %v941_v57 }
 0x8f0   :  { %945 = vxpose.xlu1.b32.start.end [1/1] (short) (narrow) %v943_v58, 8 }
 0x96b   :  { %v1066_v60 = vpop.trf.xlu0 }
 0x96c   :  { %1209 = vmatmul.mubr.msk.f32.vlgmr.msra.gmra.mrb[2].mxu1 %vm218_vm3, %v1066_v60 }
 0x970   :  { %v961_v61 = vpop.trf.xlu1 }
 0x971   :  { %1204 = vmatmul.mubr.msk.f32.vlgmr.msra.gmra.mrb[2].mxu0 %vm218_vm3, %v961_v61 }
 0xa3f   :  { %v1151_v63 = vpop.f32.mrb[2].mxu1 }
 0xa40   :  { %v1210_v0 = vpop.f32.mrb[3].mxu1  ;;  %v1157_v1 = vrot.slane %v1151_v63, 7 }
 0xa44   :  { %v1046_v25 = vpop.f32.mrb[2].mxu0 }
 0xa45   :  { %v1159_v2 = vsel %vm1158_vm14, %v1157_v1, %v1046_v25  ;;  %v1205_v32 = vpop.f32.mrb[3].mxu0 }
 0xa46   :  { %1162 = vst.msk [vmem:[#allocation2] sm:$0x3] %vm1161_vm15, %v1159_v2 }
 0xa47   :  { %1307 = shalt.err (!%p1304_p4)
}
 0xa48   :  { %s1308_s13 = scalar_lea.hbm %s1679_s3, 32 }
 0xa49   :  { %p1309_p5 = scmp.ne.s32.totalorder %s1679_s3, %s1308_s13  ;;  %p1312_p6 = scmp.lt.u32.totalorder %s1308_s13, %s1679_s3 }
 0xa4b   :  { %p1314_p7 = pnand %p1312_p6, %p1309_p5 }
 0xa4d   :  { %1317 = shalt.err (!%p1314_p7)
}
 0xa4e   :  { %1172 = dma.vmem_to_hbm [thread:$0]  %s1170_s9, 32, %s1679_s3, [#allocation3]  }
 0xa4f   :  { %1318 = dma.done.wait [#allocation3], 32  }
 0xa50   :  { %1319 = vsyncadd [#allocation3], 4294967264 }
 0xa51   :  { %1176 = vsyncpa [#allocation3], 1 }

</bundles_post_ra>
